<compile_context>
chip_gen: v6e
topology: v6e:2x2x1
jax: 0.10.0
libtpu: 0.0.40
codegen_flags: <defaults>
</compile_context>

<pallas_src>
import functools

import jax
import jax.numpy as jnp
from jax.experimental import pallas as pl
from jax.experimental.pallas import tpu as pltpu


# ----------------------------------------------------------------------------
# Fused per-layer ConvLSTM kernel.  grid = (B, T).
# Layouts: x_t (Cp, HW), h/c (Ch, HW), gates (4*Ch, HW) -- all lane-dense in HW.
# ----------------------------------------------------------------------------
def _convlstm_step_kernel(x_ref, wx_ref, wh_ref, b_ref, mask_ref,
                          h_out_ref, c_ref, h_scr,
                          *, H, W, KH, KW, Ch, mxu_dtype):
    HW = H * W
    ph, pw = KH // 2, KW // 2
    t = pl.program_id(1)

    @pl.when(t == 0)
    def _():
        # New batch element: reset the carried state.
        h_scr[...] = jnp.zeros_like(h_scr)
        c_ref[...] = jnp.zeros_like(c_ref)

    masks = mask_ref[...]                       # (KH*KW, HW) f32 {0,1} border masks

    def im2col_t(src):
        # src: (C, HW) f32 channel-major.  Tap (ky, kx) of the 'same' conv is a
        # static lane rotation of the flat spatial axis (XLU) with wrapped /
        # out-of-image lanes zeroed by the precomputed mask (one VPU multiply).
        pieces = []
        for ky in range(KH):
            for kx in range(KW):
                d = (ky - ph) * W + (kx - pw)
                if d == 0:
                    pieces.append(src)          # center tap: identity, mask == 1
                else:
                    rolled = pltpu.roll(src, (-d) % HW, axis=1)
                    tap = ky * KW + kx
                    pieces.append(rolled * masks[tap:tap + 1, :])
        # Sublane concat at multiples of 8 rows -> no relayout; cast once for MXU.
        return jnp.concatenate(pieces, axis=0).astype(mxu_dtype)   # (KH*KW*C, HW)

    xcol = im2col_t(x_ref[0, 0])                # (KH*KW*Cp, HW)
    hcol = im2col_t(h_scr[...])                 # (KH*KW*Ch, HW)

    # gates^T = W_x^T @ xcol + W_h^T @ hcol + b      (4*Ch, HW), f32 accumulation.
    gates = (jnp.dot(wx_ref[...], xcol, preferred_element_type=jnp.float32)
             + jnp.dot(wh_ref[...], hcol, preferred_element_type=jnp.float32)
             + b_ref[...])

    # Lane-dense activations: one tanh pass for the three sigmoid gates
    # (sigmoid(z) = 0.5*(tanh(z/2)+1)) and one for g; sublane slices are 8-aligned.
    sig = 0.5 * (jnp.tanh(0.5 * gates[0:3 * Ch]) + 1.0)     # (3*Ch, HW)
    g_g = jnp.tanh(gates[3 * Ch:4 * Ch])                    # (Ch,   HW)
    i_g = sig[0 * Ch:1 * Ch]
    f_g = sig[1 * Ch:2 * Ch]
    o_g = sig[2 * Ch:3 * Ch]

    c_prev = c_ref[0]                           # (Ch, HW), VMEM-resident across t
    c_next = f_g * c_prev + i_g * g_g
    h_next = o_g * jnp.tanh(c_next)

    c_ref[0] = c_next                           # lane-dense, stays resident over t
    h_out_ref[0, 0] = h_next.astype(h_out_ref.dtype)        # lane-dense store
    h_scr[...] = h_next                         # carry (kept f32: no bf16 drift)


def _convlstm_layer(x_cm, w_x_t, w_h_t, bias, masks, H, W, KH, KW, Ch, mxu_dtype):
    """x_cm: (B, T, Cp, H*W) f32 channel-major.  Returns h_seq (B,T,Ch,HW), c_last (B,Ch,HW)."""
    B, T, Cp, HW = x_cm.shape
    G = 4 * Ch
    kern = functools.partial(_convlstm_step_kernel, H=H, W=W, KH=KH, KW=KW,
                             Ch=Ch, mxu_dtype=mxu_dtype)
    h_seq, c_last = pl.pallas_call(
        kern,
        out_shape=(jax.ShapeDtypeStruct((B, T, Ch, HW), jnp.float32),
                   jax.ShapeDtypeStruct((B, Ch, HW), jnp.float32)),
        grid_spec=pltpu.PrefetchScalarGridSpec(
            num_scalar_prefetch=0,
            grid=(B, T),
            in_specs=[
                pl.BlockSpec((1, 1, Cp, HW), lambda b, t: (b, t, 0, 0)),  # stream x_t
                pl.BlockSpec((G, KH * KW * Cp), lambda b, t: (0, 0)),     # resident W_x^T
                pl.BlockSpec((G, KH * KW * Ch), lambda b, t: (0, 0)),     # resident W_h^T
                pl.BlockSpec((G, 1), lambda b, t: (0, 0)),                # bias
                pl.BlockSpec((KH * KW, HW), lambda b, t: (0, 0)),         # border masks
            ],
            out_specs=(
                pl.BlockSpec((1, 1, Ch, HW), lambda b, t: (b, t, 0, 0)),  # h_seq
                pl.BlockSpec((1, Ch, HW), lambda b, t: (b, 0, 0)),        # c (resident over t)
            ),
            scratch_shapes=[pltpu.VMEM((Ch, HW), jnp.float32)],           # carried h
        ),
        compiler_params=pltpu.CompilerParams(
            dimension_semantics=("parallel", "arbitrary")),
    )(x_cm, w_x_t, w_h_t, bias, masks)
    return h_seq, c_last


def _tap_masks(H, W, KH, KW):
    """(KH*KW, H*W) f32 {0,1}: validity of each conv tap for each output pixel."""
    ph, pw = KH // 2, KW // 2
    ys = jnp.arange(H).reshape(H, 1)
    xs = jnp.arange(W).reshape(1, W)
    rows = []
    for ky in range(KH):
        for kx in range(KW):
            dy, dx = ky - ph, kx - pw
            valid = ((ys + dy >= 0) & (ys + dy < H) &
                     (xs + dx >= 0) & (xs + dx < W))
            rows.append(valid.astype(jnp.float32).reshape(H * W))
    return jnp.stack(rows, axis=0)


# ----------------------------------------------------------------------------
# Wrapper: layout plumbing only (reshapes / weight transposes); all compute is
# inside the single Pallas kernel per layer.
# ----------------------------------------------------------------------------
def conv_lstm_forward(x_btchw, params, hidden_dims, kernel_sizes,
                      return_all_layers=False, mxu_dtype=jnp.bfloat16):
    """x_btchw: (B, T, C, H, W) float32 (batch_first), same as the PyTorch module."""
    B, T, Cin, H, W = x_btchw.shape
    HW = H * W
    cur = x_btchw.reshape(B, T, Cin, HW)        # channel-major: pure reshape, no transpose

    layer_output_list, last_state_list = [], []
    for li, (w, b) in enumerate(params):
        Ch = hidden_dims[li]
        KH, KW = kernel_sizes[li]
        Cl = cur.shape[2]
        Cp = ((Cl + 7) // 8) * 8                # pad input channels to a sublane multiple

        x_in = cur if Cp == Cl else jnp.pad(cur, ((0, 0), (0, 0), (0, Cp - Cl), (0, 0)))

        # Combined conv weight (KH*KW, Cl+Ch, 4*Ch) -> transposed input / recurrent parts.
        w_x = w[:, :Cl, :]
        if Cp != Cl:
            w_x = jnp.pad(w_x, ((0, 0), (0, Cp - Cl), (0, 0)))
        w_x_t = w_x.reshape(KH * KW * Cp, 4 * Ch).T.astype(mxu_dtype)          # (4Ch, 9*Cp)
        w_h_t = w[:, Cl:, :].reshape(KH * KW * Ch, 4 * Ch).T.astype(mxu_dtype)  # (4Ch, 9*Ch)
        bias = b.reshape(4 * Ch, 1).astype(jnp.float32)
        masks = _tap_masks(H, W, KH, KW)

        h_seq, c_last = _convlstm_layer(x_in, w_x_t, w_h_t, bias, masks,
                                        H, W, KH, KW, Ch, mxu_dtype)

        cur = h_seq                              # (B,T,Ch,HW): next layer's input, no transpose
        layer_output_list.append(h_seq.reshape(B, T, Ch, H, W))
        last_state_list.append((h_seq[:, -1].reshape(B, Ch, H, W),
                                c_last.reshape(B, Ch, H, W)))

    if not return_all_layers:
        layer_output_list = layer_output_list[-1:]
        last_state_list = last_state_list[-1:]
    return layer_output_list, last_state_list


# ----------------------------------------------------------------------------
# Pure-JAX reference (lax.conv) used only to verify the Pallas kernel.
# ----------------------------------------------------------------------------
def _ref_cell_step(x, h, c, w, b, kernel_size):
    KH, KW = kernel_size
    combined = jnp.concatenate([x, h], axis=-1)
    C = combined.shape[-1]
    w_hwio = w.reshape(KH, KW, C, -1)
    conv = jax.lax.conv_general_dilated(
        combined, w_hwio, window_strides=(1, 1), padding="SAME",
        dimension_numbers=("NHWC", "HWIO", "NHWC"),
        precision=jax.lax.Precision.HIGHEST) + b
    cc_i, cc_f, cc_o, cc_g = jnp.split(conv, 4, axis=-1)
    i = jax.nn.sigmoid(cc_i)
    f = jax.nn.sigmoid(cc_f)
    o = jax.nn.sigmoid(cc_o)
    g = jnp.tanh(cc_g)
    c_next = f * c + i * g
    h_next = o * jnp.tanh(c_next)
    return h_next, c_next


def _ref_forward(x_btchw, params, hidden_dims, kernel_sizes):
    B, T, Cin, H, W = x_btchw.shape
    cur = jnp.transpose(x_btchw, (0, 1, 3, 4, 2))
    for layer_idx, (w, b) in enumerate(params):
        Ch = hidden_dims[layer_idx]
        h = jnp.zeros((B, H, W, Ch), jnp.float32)
        c = jnp.zeros((B, H, W, Ch), jnp.float32)
        outs = []
        for t in range(T):
            h, c = _ref_cell_step(cur[:, t], h, c, w, b, kernel_sizes[layer_idx])
            outs.append(h)
        cur = jnp.stack(outs, axis=1)
    return (jnp.transpose(cur, (0, 1, 4, 2, 3)),
            jnp.transpose(h, (0, 3, 1, 2)),
            jnp.transpose(c, (0, 3, 1, 2)))


# ----------------------------------------------------------------------------
# Deterministic parameter init (shapes match ConvLSTMCell.conv = nn.Conv2d(
#   in_channels=cur_input_dim + hidden, out_channels=4*hidden, kernel, bias=True)),
# stored tap-major as (KH*KW, in_ch, 4*hidden) with gate order [i | f | o | g].
# ----------------------------------------------------------------------------
def init_params(key, input_dim, hidden_dims, kernel_sizes):
    params = []
    cur_in = input_dim
    for layer_idx, Ch in enumerate(hidden_dims):
        KH, KW = kernel_sizes[layer_idx]
        C = cur_in + Ch
        k_w, k_b, key = jax.random.split(key, 3)
        fan_in = C * KH * KW
        w = jax.random.normal(k_w, (KH * KW, C, 4 * Ch), jnp.float32) / jnp.sqrt(fan_in)
        b = jax.random.normal(k_b, (4 * Ch,), jnp.float32) * 0.01
        params.append((w, b))
        cur_in = Ch
    return params


if __name__ == "__main__":
    B, T, Cin, H, W = 2, 8, 4, 16, 16
    hidden_dims = [32, 32]            # 4*Ch = 128 gate rows, Ch = 32 state rows
    kernel_sizes = [(3, 3), (3, 3)]

    key = jax.random.PRNGKey(0)
    k_x, k_p = jax.random.split(key)
    x = jax.random.normal(k_x, (B, T, Cin, H, W), jnp.float32)
    params = init_params(k_p, Cin, hidden_dims, kernel_sizes)

    ref_out, ref_h, ref_c = _ref_forward(x, params, hidden_dims, kernel_sizes)

    # --- f32 MXU operands: exact-path check against the lax.conv reference ---
    outs_f32, states_f32 = conv_lstm_forward(
        x, params, hidden_dims, kernel_sizes, mxu_dtype=jnp.float32)
    out32, (h32, c32) = outs_f32[0], states_f32[0]
    jax.block_until_ready((out32, h32, c32))
    assert out32.shape == (B, T, hidden_dims[-1], H, W)
    assert h32.shape == (B, hidden_dims[-1], H, W)
    assert c32.shape == (B, hidden_dims[-1], H, W)
    assert jnp.allclose(out32, ref_out, atol=2e-3, rtol=2e-3)
    assert jnp.allclose(h32, ref_h, atol=2e-3, rtol=2e-3)
    assert jnp.allclose(c32, ref_c, atol=2e-3, rtol=2e-3)

    # --- bf16 MXU operands (f32 accumulation + f32 gate/state math): perf config ---
    outs_bf, states_bf = conv_lstm_forward(
        x, params, hidden_dims, kernel_sizes, mxu_dtype=jnp.bfloat16)
    outbf, (hbf, cbf) = outs_bf[0], states_bf[0]
    jax.block_until_ready((outbf, hbf, cbf))
    assert jnp.allclose(outbf, ref_out, atol=1e-1, rtol=1e-1)
    assert jnp.allclose(hbf, ref_h, atol=1e-1, rtol=1e-1)
    assert jnp.allclose(cbf, ref_c, atol=1e-1, rtol=1e-1)

    print("KERNEL_OK")
</pallas_src>

<mosaic_0001>
module attributes {stable_mosaic.version = 11 : i64} {
  func.func @_convlstm_step_kernel(%arg0: i32, %arg1: i32, %arg2: memref<1x1x8x256xf32, #tpu.memory_space<vmem>>, %arg3: memref<128x72xf32, #tpu.memory_space<vmem>>, %arg4: memref<128x288xf32, #tpu.memory_space<vmem>>, %arg5: memref<128x1xf32, #tpu.memory_space<vmem>>, %arg6: memref<9x256xf32, #tpu.memory_space<vmem>>, %arg7: memref<1x1x32x256xf32, #tpu.memory_space<vmem>>, %arg8: memref<1x32x256xf32, #tpu.memory_space<vmem>>, %arg9: memref<32x256xf32, #tpu.memory_space<vmem>>) attributes {dimension_semantics = [#tpu.dimension_semantics<parallel>, #tpu.dimension_semantics<arbitrary>], iteration_bounds = array<i64: 2, 8>, scalar_prefetch = 0 : i64, scratch_operands = 1 : i64, tpu.core_type = #tpu.core_type<tc>, window_params = [{transform_indices = @transform_0, window_bounds = array<i64: 1, 1, 8, 256>}, {pipeline_mode = #tpu.pipeline_mode<synchronous>, transform_indices = @transform_1, window_bounds = array<i64: 128, 72>}, {pipeline_mode = #tpu.pipeline_mode<synchronous>, transform_indices = @transform_2, window_bounds = array<i64: 128, 288>}, {pipeline_mode = #tpu.pipeline_mode<synchronous>, transform_indices = @transform_3, window_bounds = array<i64: 128, 1>}, {pipeline_mode = #tpu.pipeline_mode<synchronous>, transform_indices = @transform_4, window_bounds = array<i64: 9, 256>}, {transform_indices = @transform_5, window_bounds = array<i64: 1, 1, 32, 256>}, {transform_indices = @transform_6, window_bounds = array<i64: 1, 32, 256>}]} {
    %c0_i32 = arith.constant 0 : i32
    %0 = arith.cmpi eq, %arg1, %c0_i32 : i32
    %1 = arith.extui %0 : i1 to i32
    %c0_i32_0 = arith.constant 0 : i32
    %2 = arith.cmpi ne, %1, %c0_i32_0 : i32
    scf.if %2 {
      %cst_38 = arith.constant 0.000000e+00 : f32
      %108 = vector.broadcast %cst_38 : f32 to vector<32x256xf32>
      %c0_39 = arith.constant 0 : index
      %c0_40 = arith.constant 0 : index
      %109 = vector.load %arg9[%c0_39, %c0_40] : memref<32x256xf32, #tpu.memory_space<vmem>>, vector<32x256xf32>
      tpu.vector_store %arg9[%c0_39, %c0_40], %108 {strides = array<i32>} : memref<32x256xf32, #tpu.memory_space<vmem>>, vector<32x256xf32>,
      %cst_41 = arith.constant 0.000000e+00 : f32
      %110 = vector.broadcast %cst_41 : f32 to vector<1x32x256xf32>
      %c0_42 = arith.constant 0 : index
      %c0_43 = arith.constant 0 : index
      %c0_44 = arith.constant 0 : index
      %111 = vector.load %arg8[%c0_42, %c0_43, %c0_44] : memref<1x32x256xf32, #tpu.memory_space<vmem>>, vector<1x32x256xf32>
      tpu.vector_store %arg8[%c0_42, %c0_43, %c0_44], %110 {strides = array<i32>} : memref<1x32x256xf32, #tpu.memory_space<vmem>>, vector<1x32x256xf32>,
    } else {
    }
    %c0 = arith.constant 0 : index
    %c0_1 = arith.constant 0 : index
    %3 = vector.load %arg6[%c0, %c0_1] : memref<9x256xf32, #tpu.memory_space<vmem>>, vector<9x256xf32>
    %c0_2 = arith.constant 0 : index
    %c0_3 = arith.constant 0 : index
    %c0_4 = arith.constant 0 : index
    %c0_5 = arith.constant 0 : index
    %4 = vector.load %arg2[%c0_2, %c0_3, %c0_4, %c0_5] : memref<1x1x8x256xf32, #tpu.memory_space<vmem>>, vector<1x1x8x256xf32>
    %5 = vector.shape_cast %4 : vector<1x1x8x256xf32> to vector<8x256xf32>
    %c17_i32 = arith.constant 17 : i32
    %6 = tpu.dynamic_rotate %5 by %c17_i32 dim 1 : vector<8x256xf32>, i32 -> vector<8x256xf32>
    %7 = vector.extract_strided_slice %3 {offsets = [0, 0], sizes = [1, 256], strides = [1, 1]} : vector<9x256xf32> to vector<1x256xf32>
    %8 = vector.broadcast %7 : vector<1x256xf32> to vector<8x256xf32>
    %9 = arith.mulf %6, %8 : vector<8x256xf32>
    %c16_i32 = arith.constant 16 : i32
    %10 = tpu.dynamic_rotate %5 by %c16_i32 dim 1 : vector<8x256xf32>, i32 -> vector<8x256xf32>
    %11 = vector.extract_strided_slice %3 {offsets = [1, 0], sizes = [1, 256], strides = [1, 1]} : vector<9x256xf32> to vector<1x256xf32>
    %12 = vector.broadcast %11 : vector<1x256xf32> to vector<8x256xf32>
    %13 = arith.mulf %10, %12 : vector<8x256xf32>
    %c15_i32 = arith.constant 15 : i32
    %14 = tpu.dynamic_rotate %5 by %c15_i32 dim 1 : vector<8x256xf32>, i32 -> vector<8x256xf32>
    %15 = vector.extract_strided_slice %3 {offsets = [2, 0], sizes = [1, 256], strides = [1, 1]} : vector<9x256xf32> to vector<1x256xf32>
    %16 = vector.broadcast %15 : vector<1x256xf32> to vector<8x256xf32>
    %17 = arith.mulf %14, %16 : vector<8x256xf32>
    %c1_i32 = arith.constant 1 : i32
    %18 = tpu.dynamic_rotate %5 by %c1_i32 dim 1 : vector<8x256xf32>, i32 -> vector<8x256xf32>
    %19 = vector.extract_strided_slice %3 {offsets = [3, 0], sizes = [1, 256], strides = [1, 1]} : vector<9x256xf32> to vector<1x256xf32>
    %20 = vector.broadcast %19 : vector<1x256xf32> to vector<8x256xf32>
    %21 = arith.mulf %18, %20 : vector<8x256xf32>
    %c255_i32 = arith.constant 255 : i32
    %22 = tpu.dynamic_rotate %5 by %c255_i32 dim 1 : vector<8x256xf32>, i32 -> vector<8x256xf32>
    %23 = vector.extract_strided_slice %3 {offsets = [5, 0], sizes = [1, 256], strides = [1, 1]} : vector<9x256xf32> to vector<1x256xf32>
    %24 = vector.broadcast %23 : vector<1x256xf32> to vector<8x256xf32>
    %25 = arith.mulf %22, %24 : vector<8x256xf32>
    %c241_i32 = arith.constant 241 : i32
    %26 = tpu.dynamic_rotate %5 by %c241_i32 dim 1 : vector<8x256xf32>, i32 -> vector<8x256xf32>
    %27 = vector.extract_strided_slice %3 {offsets = [6, 0], sizes = [1, 256], strides = [1, 1]} : vector<9x256xf32> to vector<1x256xf32>
    %28 = vector.broadcast %27 : vector<1x256xf32> to vector<8x256xf32>
    %29 = arith.mulf %26, %28 : vector<8x256xf32>
    %c240_i32 = arith.constant 240 : i32
    %30 = tpu.dynamic_rotate %5 by %c240_i32 dim 1 : vector<8x256xf32>, i32 -> vector<8x256xf32>
    %31 = vector.extract_strided_slice %3 {offsets = [7, 0], sizes = [1, 256], strides = [1, 1]} : vector<9x256xf32> to vector<1x256xf32>
    %32 = vector.broadcast %31 : vector<1x256xf32> to vector<8x256xf32>
    %33 = arith.mulf %30, %32 : vector<8x256xf32>
    %c239_i32 = arith.constant 239 : i32
    %34 = tpu.dynamic_rotate %5 by %c239_i32 dim 1 : vector<8x256xf32>, i32 -> vector<8x256xf32>
    %35 = vector.extract_strided_slice %3 {offsets = [8, 0], sizes = [1, 256], strides = [1, 1]} : vector<9x256xf32> to vector<1x256xf32>
    %36 = vector.broadcast %35 : vector<1x256xf32> to vector<8x256xf32>
    %37 = arith.mulf %34, %36 : vector<8x256xf32>
    %38 = tpu.concatenate %9, %13, %17, %21, %5, %25, %29, %33, %37 in 0 : vector<8x256xf32>, vector<8x256xf32>, vector<8x256xf32>, vector<8x256xf32>, vector<8x256xf32>, vector<8x256xf32>, vector<8x256xf32>, vector<8x256xf32>, vector<8x256xf32> -> vector<72x256xf32>
    %c0_6 = arith.constant 0 : index
    %c0_7 = arith.constant 0 : index
    %39 = vector.load %arg9[%c0_6, %c0_7] : memref<32x256xf32, #tpu.memory_space<vmem>>, vector<32x256xf32>
    %c17_i32_8 = arith.constant 17 : i32
    %40 = tpu.dynamic_rotate %39 by %c17_i32_8 dim 1 : vector<32x256xf32>, i32 -> vector<32x256xf32>
    %41 = vector.extract_strided_slice %3 {offsets = [0, 0], sizes = [1, 256], strides = [1, 1]} : vector<9x256xf32> to vector<1x256xf32>
    %42 = vector.broadcast %41 : vector<1x256xf32> to vector<32x256xf32>
    %43 = arith.mulf %40, %42 : vector<32x256xf32>
    %c16_i32_9 = arith.constant 16 : i32
    %44 = tpu.dynamic_rotate %39 by %c16_i32_9 dim 1 : vector<32x256xf32>, i32 -> vector<32x256xf32>
    %45 = vector.extract_strided_slice %3 {offsets = [1, 0], sizes = [1, 256], strides = [1, 1]} : vector<9x256xf32> to vector<1x256xf32>
    %46 = vector.broadcast %45 : vector<1x256xf32> to vector<32x256xf32>
    %47 = arith.mulf %44, %46 : vector<32x256xf32>
    %c15_i32_10 = arith.constant 15 : i32
    %48 = tpu.dynamic_rotate %39 by %c15_i32_10 dim 1 : vector<32x256xf32>, i32 -> vector<32x256xf32>
    %49 = vector.extract_strided_slice %3 {offsets = [2, 0], sizes = [1, 256], strides = [1, 1]} : vector<9x256xf32> to vector<1x256xf32>
    %50 = vector.broadcast %49 : vector<1x256xf32> to vector<32x256xf32>
    %51 = arith.mulf %48, %50 : vector<32x256xf32>
    %c1_i32_11 = arith.constant 1 : i32
    %52 = tpu.dynamic_rotate %39 by %c1_i32_11 dim 1 : vector<32x256xf32>, i32 -> vector<32x256xf32>
    %53 = vector.extract_strided_slice %3 {offsets = [3, 0], sizes = [1, 256], strides = [1, 1]} : vector<9x256xf32> to vector<1x256xf32>
    %54 = vector.broadcast %53 : vector<1x256xf32> to vector<32x256xf32>
    %55 = arith.mulf %52, %54 : vector<32x256xf32>
    %c255_i32_12 = arith.constant 255 : i32
    %56 = tpu.dynamic_rotate %39 by %c255_i32_12 dim 1 : vector<32x256xf32>, i32 -> vector<32x256xf32>
    %57 = vector.extract_strided_slice %3 {offsets = [5, 0], sizes = [1, 256], strides = [1, 1]} : vector<9x256xf32> to vector<1x256xf32>
    %58 = vector.broadcast %57 : vector<1x256xf32> to vector<32x256xf32>
    %59 = arith.mulf %56, %58 : vector<32x256xf32>
    %c241_i32_13 = arith.constant 241 : i32
    %60 = tpu.dynamic_rotate %39 by %c241_i32_13 dim 1 : vector<32x256xf32>, i32 -> vector<32x256xf32>
    %61 = vector.extract_strided_slice %3 {offsets = [6, 0], sizes = [1, 256], strides = [1, 1]} : vector<9x256xf32> to vector<1x256xf32>
    %62 = vector.broadcast %61 : vector<1x256xf32> to vector<32x256xf32>
    %63 = arith.mulf %60, %62 : vector<32x256xf32>
    %c240_i32_14 = arith.constant 240 : i32
    %64 = tpu.dynamic_rotate %39 by %c240_i32_14 dim 1 : vector<32x256xf32>, i32 -> vector<32x256xf32>
    %65 = vector.extract_strided_slice %3 {offsets = [7, 0], sizes = [1, 256], strides = [1, 1]} : vector<9x256xf32> to vector<1x256xf32>
    %66 = vector.broadcast %65 : vector<1x256xf32> to vector<32x256xf32>
    %67 = arith.mulf %64, %66 : vector<32x256xf32>
    %c239_i32_15 = arith.constant 239 : i32
    %68 = tpu.dynamic_rotate %39 by %c239_i32_15 dim 1 : vector<32x256xf32>, i32 -> vector<32x256xf32>
    %69 = vector.extract_strided_slice %3 {offsets = [8, 0], sizes = [1, 256], strides = [1, 1]} : vector<9x256xf32> to vector<1x256xf32>
    %70 = vector.broadcast %69 : vector<1x256xf32> to vector<32x256xf32>
    %71 = arith.mulf %68, %70 : vector<32x256xf32>
    %72 = tpu.concatenate %43, %47, %51, %55, %39, %59, %63, %67, %71 in 0 : vector<32x256xf32>, vector<32x256xf32>, vector<32x256xf32>, vector<32x256xf32>, vector<32x256xf32>, vector<32x256xf32>, vector<32x256xf32>, vector<32x256xf32>, vector<32x256xf32> -> vector<288x256xf32>
    %c0_16 = arith.constant 0 : index
    %c0_17 = arith.constant 0 : index
    %73 = vector.load %arg3[%c0_16, %c0_17] : memref<128x72xf32, #tpu.memory_space<vmem>>, vector<128x72xf32>
    %cst = arith.constant dense<0.000000e+00> : vector<128x256xf32>
    %74 = tpu.matmul %73, %38, %cst {dimension_numbers = #tpu.dot_dimension_numbers<[1], [0], [0], [1], [0, 0, 1, 1], [], []>} : vector<128x72xf32>, vector<72x256xf32>, vector<128x256xf32> -> vector<128x256xf32>
    %c0_18 = arith.constant 0 : index
    %c0_19 = arith.constant 0 : index
    %75 = vector.load %arg4[%c0_18, %c0_19] : memref<128x288xf32, #tpu.memory_space<vmem>>, vector<128x288xf32>
    %cst_20 = arith.constant dense<0.000000e+00> : vector<128x256xf32>
    %76 = tpu.matmul %75, %72, %cst_20 {dimension_numbers = #tpu.dot_dimension_numbers<[1], [0], [0], [1], [0, 0, 1, 1], [], []>} : vector<128x288xf32>, vector<288x256xf32>, vector<128x256xf32> -> vector<128x256xf32>
    %77 = arith.addf %74, %76 : vector<128x256xf32>
    %c0_21 = arith.constant 0 : index
    %c0_22 = arith.constant 0 : index
    %78 = vector.load %arg5[%c0_21, %c0_22] : memref<128x1xf32, #tpu.memory_space<vmem>>, vector<128x1xf32>
    %79 = vector.broadcast %78 : vector<128x1xf32> to vector<128x256xf32>
    %80 = arith.addf %77, %79 : vector<128x256xf32>
    %81 = vector.extract_strided_slice %80 {offsets = [0, 0], sizes = [96, 256], strides = [1, 1]} : vector<128x256xf32> to vector<96x256xf32>
    %cst_23 = arith.constant 5.000000e-01 : f32
    %82 = vector.broadcast %cst_23 : f32 to vector<96x256xf32>
    %83 = arith.mulf %82, %81 : vector<96x256xf32>
    %84 = math.tanh %83 : vector<96x256xf32>
    %cst_24 = arith.constant 1.000000e+00 : f32
    %85 = vector.broadcast %cst_24 : f32 to vector<96x256xf32>
    %86 = arith.addf %84, %85 : vector<96x256xf32>
    %cst_25 = arith.constant 5.000000e-01 : f32
    %87 = vector.broadcast %cst_25 : f32 to vector<96x256xf32>
    %88 = arith.mulf %87, %86 : vector<96x256xf32>
    %89 = vector.extract_strided_slice %80 {offsets = [96, 0], sizes = [32, 256], strides = [1, 1]} : vector<128x256xf32> to vector<32x256xf32>
    %90 = math.tanh %89 : vector<32x256xf32>
    %91 = vector.extract_strided_slice %88 {offsets = [0, 0], sizes = [32, 256], strides = [1, 1]} : vector<96x256xf32> to vector<32x256xf32>
    %92 = vector.extract_strided_slice %88 {offsets = [32, 0], sizes = [32, 256], strides = [1, 1]} : vector<96x256xf32> to vector<32x256xf32>
    %93 = vector.extract_strided_slice %88 {offsets = [64, 0], sizes = [32, 256], strides = [1, 1]} : vector<96x256xf32> to vector<32x256xf32>
    %c0_26 = arith.constant 0 : index
    %c0_27 = arith.constant 0 : index
    %c0_28 = arith.constant 0 : index
    %94 = vector.load %arg8[%c0_26, %c0_27, %c0_28] : memref<1x32x256xf32, #tpu.memory_space<vmem>>, vector<1x32x256xf32>
    %95 = vector.shape_cast %94 : vector<1x32x256xf32> to vector<32x256xf32>
    %96 = arith.mulf %92, %95 : vector<32x256xf32>
    %97 = arith.mulf %91, %90 : vector<32x256xf32>
    %98 = arith.addf %96, %97 : vector<32x256xf32>
    %99 = math.tanh %98 : vector<32x256xf32>
    %100 = arith.mulf %93, %99 : vector<32x256xf32>
    %c0_29 = arith.constant 0 : index
    %c0_30 = arith.constant 0 : index
    %c0_31 = arith.constant 0 : index
    %101 = vector.load %arg8[%c0_29, %c0_30, %c0_31] : memref<1x32x256xf32, #tpu.memory_space<vmem>>, vector<1x32x256xf32>
    %102 = vector.shape_cast %101 : vector<1x32x256xf32> to vector<32x256xf32>
    %103 = vector.shape_cast %98 : vector<32x256xf32> to vector<1x32x256xf32>
    tpu.vector_store %arg8[%c0_29, %c0_30, %c0_31], %103 {strides = array<i32>} : memref<1x32x256xf32, #tpu.memory_space<vmem>>, vector<1x32x256xf32>,
    %c0_32 = arith.constant 0 : index
    %c0_33 = arith.constant 0 : index
    %c0_34 = arith.constant 0 : index
    %c0_35 = arith.constant 0 : index
    %104 = vector.load %arg7[%c0_32, %c0_33, %c0_34, %c0_35] : memref<1x1x32x256xf32, #tpu.memory_space<vmem>>, vector<1x1x32x256xf32>
    %105 = vector.shape_cast %104 : vector<1x1x32x256xf32> to vector<32x256xf32>
    %106 = vector.shape_cast %100 : vector<32x256xf32> to vector<1x1x32x256xf32>
    tpu.vector_store %arg7[%c0_32, %c0_33, %c0_34, %c0_35], %106 {strides = array<i32>} : memref<1x1x32x256xf32, #tpu.memory_space<vmem>>, vector<1x1x32x256xf32>,
    %c0_36 = arith.constant 0 : index
    %c0_37 = arith.constant 0 : index
    %107 = vector.load %arg9[%c0_36, %c0_37] : memref<32x256xf32, #tpu.memory_space<vmem>>, vector<32x256xf32>
    tpu.vector_store %arg9[%c0_36, %c0_37], %100 {strides = array<i32>} : memref<32x256xf32, #tpu.memory_space<vmem>>, vector<32x256xf32>,
    return
  }
  func.func @transform_0(%arg0: i32, %arg1: i32) -> (i32, i32, i32, i32) {
    %c0_i32 = arith.constant 0 : i32
    %c0_i32_0 = arith.constant 0 : i32
    %c0_i32_1 = arith.constant 0 : i32
    return %arg0, %arg1, %c0_i32, %c0_i32_0 : i32, i32, i32, i32
  }
  func.func @transform_1(%arg0: i32, %arg1: i32) -> (i32, i32) {
    %c0_i32 = arith.constant 0 : i32
    %c0_i32_0 = arith.constant 0 : i32
    %c0_i32_1 = arith.constant 0 : i32
    return %c0_i32, %c0_i32_0 : i32, i32
  }
  func.func @transform_2(%arg0: i32, %arg1: i32) -> (i32, i32) {
    %c0_i32 = arith.constant 0 : i32
    %c0_i32_0 = arith.constant 0 : i32
    %c0_i32_1 = arith.constant 0 : i32
    return %c0_i32, %c0_i32_0 : i32, i32
  }
  func.func @transform_3(%arg0: i32, %arg1: i32) -> (i32, i32) {
    %c0_i32 = arith.constant 0 : i32
    %c0_i32_0 = arith.constant 0 : i32
    %c0_i32_1 = arith.constant 0 : i32
    return %c0_i32, %c0_i32_0 : i32, i32
  }
  func.func @transform_4(%arg0: i32, %arg1: i32) -> (i32, i32) {
    %c0_i32 = arith.constant 0 : i32
    %c0_i32_0 = arith.constant 0 : i32
    %c0_i32_1 = arith.constant 0 : i32
    return %c0_i32, %c0_i32_0 : i32, i32
  }
  func.func @transform_5(%arg0: i32, %arg1: i32) -> (i32, i32, i32, i32) {
    %c0_i32 = arith.constant 0 : i32
    %c0_i32_0 = arith.constant 0 : i32
    %c0_i32_1 = arith.constant 0 : i32
    return %arg0, %arg1, %c0_i32, %c0_i32_0 : i32, i32, i32, i32
  }
  func.func @transform_6(%arg0: i32, %arg1: i32) -> (i32, i32, i32) {
    %c0_i32 = arith.constant 0 : i32
    %c0_i32_0 = arith.constant 0 : i32
    %c0_i32_1 = arith.constant 0 : i32
    return %arg0, %c0_i32, %c0_i32_0 : i32, i32, i32
  }
}

</mosaic_0001>

<bundles_post_ra>
// kernel: tpu_custom_call.1
= control target key start
LH: loop header
LB: loop body
LE: loop exit
PB: predicated region body
PF: predicated region fallthrough
CT: control target
= control target key end

     0   :  { %12 = vsyncpa [#allocation4], 0  ;;  %s3647_s0 = inlined_call_operand.vmem [shape: f32[2,8,8,256], index: 0, kind: input, shape index: {}]   ;;  %s3648_s1 = inlined_call_operand.vmem [shape: f32[128,72], index: 1, kind: input, shape index: {}]   ;;  %s3649_s2 = inlined_call_operand.vmem [shape: f32[128,288], index: 2, kind: input, shape index: {}]   ;;  %s3650_s3 = inlined_call_operand.vmem [shape: f32[128,1], index: 3, kind: input, shape index: {}]   ;;  %s3651_s4 = inlined_call_operand.vmem [shape: f32[9,256], index: 4, kind: input, shape index: {}]   ;;  %s3652_s5 = inlined_call_operand.hbm [shape: f32[2,8,32,256], index: 5, kind: output, shape index: {0}]   ;;  %s3653_s6 = inlined_call_operand.hbm [shape: f32[2,32,256], index: 6, kind: output, shape index: {1}]  }
   0x1   :  { %14 = vsyncpa [#allocation4 + $0x1], 0 }
   0x2   :  { %15 = vsyncpa [#allocation6], 0 }
   0x3   :  { %17 = vsyncpa [#allocation6 + $0x1], 0  ;;  %s2274_s21 = smov 0   ;;  %s2276_s22 = smov 0  }
   0x4   :  { %s2278_s23 = smov 0   ;;  %s2280_s24 = smov 0  }
   0x5   :  { %s2282_s25 = smov 0   ;;  %s2284_s26 = smov 0  }
   0x6   :  { %s2286_s27 = smov 0   ;;  %s2288_s28 = smov 0  }
   0x7   :  { %s2290_s29 = smov 0   ;;  %s2292_s30 = smov 0  }
   0x8   :  { %s2294_s7 = smov 0  }
   0x9 LB: > { %3665 = sst [smem:[#allocation9_spill]] %s2183_s21  ;;  %s1820_s8 = sadd.s32 4294967295, %s2223_s7   ;;  %s2223_s7 = sphi %s2294_s7, %s23_s7   ;;  %s2219_s30 = sphi %s2292_s30, %s3714_s30   ;;  %s2215_s29 = sphi %s2290_s29, %s3713_s29   ;;  %s2211_s28 = sphi %s2288_s28, %s3712_s28   ;;  %s2207_s27 = sphi %s2286_s27, %s3711_s27   ;;  %s2203_s26 = sphi %s2284_s26, %s3710_s26   ;;  %s2199_s25 = sphi %s2282_s25, %s3718_s25   ;;  %s2195_s24 = sphi %s2280_s24, %s3717_s24   ;;  %s2191_s23 = sphi %s2278_s23, %s3708_s23   ;;  %s2187_s22 = sphi %s2276_s22, %s3716_s22   ;;  %s2183_s21 = sphi %s2274_s21, %s3715_s21  }
   0xa   : > { %3666 = sst [smem:[#allocation10_spill]] %s2191_s23  ;;  %s1821_s9 = sadd.s32 4294967294, %s2223_s7  }
   0xb   : > { %3667 = sst [smem:[#allocation11_spill]] %s2203_s26  ;;  %s32_s10 = sadd.s32 1, %s2215_s29 }
   0xc   : > { %3668 = sst [smem:[#allocation12_spill]] %s2215_s29  ;;  %s35_s11 = sadd.s32 1, %s2219_s30 }
   0xd   : > { %3669 = sst [smem:[#allocation13_spill]] %s2219_s30  ;;  %p33_p0 = scmp.ge.s32.totalorder %s32_s10, 8 }
   0xe   : > { %s156_s12 = sadd.s32 1, %s2203_s26  ;;  %p166_p1 = scmp.ne.s32.totalorder %s2203_s26, %s2199_s25 }
   0xf   : > { %p2336_p2 = scmp.eq.s32.totalorder %s1820_s8, 15  ;;  %s3720_s10 = smov (%p33_p0, %s32_s10), 0 }
  0x10   : > { %3671 = sst [smem:[#allocation14_spill]] %s3720_s10  ;;  %s3722_s11 = smov (!%p33_p0, %s35_s11), %s2219_s30 }
  0x11   : > { %s152_s14 = ssub.s32 %s2215_s29, %s3720_s10  ;;  %p2347_p3 = por %p2336_p2, %p166_p1 }
  0x12   : > { %p37_p4 = scmp.ge.s32.totalorder %s3722_s11, 2  ;;  %p172_p5 = scmp.ne.s32.totalorder %s2199_s25, %s2195_s24 }
  0x13   : > { %p2353_p6 = scmp.eq.s32.totalorder %s1821_s9, 15  ;;  %s182_s17 = sadd.s32 1, %s2191_s23 }
  0x14   : > { %s3724_s11 = smov (%p37_p4, %s3722_s11), 0  ;;  %p192_p8 = scmp.ne.s32.totalorder %s2191_s23, %s2187_s22 }
  0x15   : > { %3674 = sst [smem:[#allocation15_spill]] %s3724_s11  ;;  %p2362_p7 = por %p2353_p6, %p172_p5 }
  0x16   : > { %s151_s19 = ssub.s32 %s2219_s30, %s3724_s11  ;;  %p198_p9 = scmp.ne.s32.totalorder %s2187_s22, %s2183_s21 }
  0x17   : > { %s153_s20 = sor.u32 %s152_s14, %s151_s19  ;;  %p180_p10 = scmp.eq.s32.totalorder %s151_s19, 0 }
  0x18   : > { %p154_p11 = scmp.eq.s32.totalorder %s153_s20, 0  ;;  %p2374_p12 = por %p192_p8, %p2336_p2 }
  0x19   : > { %s2379_s9 = scalar_select %p180_p10, %s2191_s23, %s182_s17  }
  0x1a   : > { %s2382_s10 = scalar_select %p154_p11, %s2203_s26, %s156_s12  }
  0x1b   : > { %3677 = sst [smem:[#allocation16_spill]] %s2379_s9  ;;  %p2386_p13 = por %p198_p9, %p2353_p6 }
  0x1c   : > { %3678 = sst [smem:[#allocation17_spill]] %s2382_s10  ;;  %p1824_p0 = scmp.ge.s32.totalorder %s2223_s7, 1 }
  0x1d   : > { %s3679_s29 = scalar_select %p2386_p13, 1, 0 }
  0x1e   : > { %p241_p1 = scmp.lt.s32.totalorder %s2223_s7, 17 }
  0x1f   : > { %3680 = sst [smem:[#allocation18_spill]] %s3679_s29 }
  0x20   : > { %p242_p4 = pnand %p1824_p0, %p241_p1 }
  0x22   : > { %245 = sbr.rel (%p242_p4) target bundleno = 657 (0x291), region = 40 }
  0x27   : > { %s3662_s13 = sand.u32 1, %s2199_s25   ;;  %s3663_s12 = sand.u32 1, %s2187_s22  }
  0x28   : > { %s1825_s14 = sshll.u32 %s3662_s13, 6  ;;  %s1826_s16 = sshll.u32 %s3663_s12, 6 }
  0x29   : > { %p280_p2 = scmp.lt.s32.totalorder %s2211_s28, 1  ;;  %p282_p5 = scmp.lt.s32.totalorder %s2207_s27, 7 }
  0x2a   : > { %s2407_s29 = scalar_lea.vmem [#allocation3], %s1825_s14  ;;  %s2409_s21 = scalar_lea.vmem [#allocation5], %s1826_s16 }
  0x2b   : > { %s281_s17 = scalar_select %p280_p2, %s2211_s28, 1 }
  0x2c   : > { %s283_s19 = scalar_select %p282_p5, %s2207_s27, 7 }
  0x2d   : > { %s1828_s20 = sshll.u32 %s281_s17, 4  ;;  %p1830_p6 = scmp.ne.s32.totalorder %s2207_s27, 0 }
  0x2e   : > { %s1827_s11 = sshll.u32 %s283_s19, 1 }
  0x2f   : > { %s286_s30 = sadd.s32 %s1828_s20, %s1827_s11  ;;  %292 = sbr.rel (%p1830_p6) target bundleno = 61 (0x3d), region = 44 }
  0x30   : > { %s1829_s10 = sshll.u32 %s286_s30, 3 }
  0x31   : > { %s2405_s23 = scalar_lea.vmem %s3647_s0, %s1829_s10 }
  0x34   : > { %v2225_v0 = vmov 0.0  }
  0x35   : > { %293 = vst [vmem:[#allocation2 + $0x30] sm:$0xff] %v2225_v0  ;;  %294 = vst [vmem:[#allocation2] sm:$0xff] %v2225_v0 }
  0x36   : > { %295 = vst [vmem:[#allocation2 + $0x18] sm:$0xff] %v2225_v0  ;;  %296 = vst [vmem:[#allocation2 + $0x10] sm:$0xff] %v2225_v0 }
  0x37   : > { %297 = vst [vmem:[#allocation2 + $0x8] sm:$0xff] %v2225_v0  ;;  %298 = vst [vmem:[#allocation2 + $0x20] sm:$0xff] %v2225_v0 }
  0x38   : > { %299 = vst [vmem:[#allocation2 + $0x28] sm:$0xff] %v2225_v0  ;;  %300 = vst [vmem:[#allocation2 + $0x38] sm:$0xff] %v2225_v0 }
  0x39   : > { %301 = vst [vmem:[%s2409_s21] sm:$0xff] %v2225_v0  ;;  %302 = vst [vmem:[%s2409_s21 + $0x8] sm:$0xff] %v2225_v0 }
  0x3a   : > { %303 = vst [vmem:[%s2409_s21 + $0x10] sm:$0xff] %v2225_v0  ;;  %304 = vst [vmem:[%s2409_s21 + $0x18] sm:$0xff] %v2225_v0 }
  0x3b   : > { %305 = vst [vmem:[%s2409_s21 + $0x20] sm:$0xff] %v2225_v0  ;;  %306 = vst [vmem:[%s2409_s21 + $0x28] sm:$0xff] %v2225_v0 }
  0x3c   : > { %307 = vst [vmem:[%s2409_s21 + $0x30] sm:$0xff] %v2225_v0  ;;  %308 = vst [vmem:[%s2409_s21 + $0x38] sm:$0xff] %v2225_v0 }
  0x3d PF: > { %s2226_s26 = smov 1   ;;  %v2436_v5 = vld [vmem:[#allocation2 + $0x10] sm:$0xff]  ;;  %v2438_v6 = vld [vmem:[#allocation2 + $0x18] sm:$0xff]  ;;  %v2444_v7 = vld [vmem:[#allocation2] sm:$0xff]  ;;  %s2227_s30 = smov 15   ;;  %v2232_v9 = vmov 0.0   ;;  %v319_v10 = vlaneseq }
  0x3e   : > { %v2420_v1 = vld [vmem:[#allocation2 + $0x8] sm:$0xff]  ;;  %v2428_v3 = vld [vmem:[#allocation2 + $0x20] sm:$0xff]  ;;  %v2446_v8 = vld [vmem:[#allocation2 + $0x30] sm:$0xff]  ;;  %s2228_s10 = smov 111   ;;  %s2229_s11 = smov 16   ;;  %1061 = vmatprep.mubr.f32.mxu1 %v2232_v9  ;;  %vm781_vm4 = vcmask 261120  }
  0x3f   : > { %v2422_v2 = vld [vmem:[#allocation2 + $0x28] sm:$0xff]  ;;  %561 = vrot.lane.b32.xlu1 %v2420_v1, %s2226_s26  ;;  %v2430_v4 = vld [vmem:[#allocation2 + $0x38] sm:$0xff]  ;;  %s2230_s9 = smov 17   ;;  %s2231_s14 = smov 112   ;;  %v2549_v11 = vshrl.u32 %v319_v10, 7  ;;  %v2555_v12 = vand.u32 127, %v319_v10 }
  0x40   : > { %563 = vrot.lane.b32.xlu0 %v2422_v2, %s2226_s26  ;;  %s2233_s16 = smov 113   ;;  %s2234_s17 = smov 127   ;;  %v2561_v14 = vld [vmem:[%s3651_s4 + $0x8] sm:$0xff]  ;;  %v2566_v17 = vld [vmem:[%s3651_s4] sm:$0xff]  ;;  %v2646_v54 = vld [vmem:[%s3651_s4 + $0x18] ss:$0 sm:$0xff] }
  0x41   : > { %v377_v13 = vsub.s32 3, %v2549_v11  ;;  %vm372_vm0 = vcmp.lt.s32.totalorder %v2555_v12, 1  ;;  %v360_v33 = vsub.s32 2, %v2549_v11  ;;  %v734_v34 = vld [vmem:[%s3649_s2 + $0x8] sm:$0xff]  ;;  %v2613_v41 = vld [vmem:[%s2405_s23] sm:$0xff]  ;;  %vm355_vm1 = vcmp.lt.s32.totalorder %v2555_v12, 15 }
  0x42   : > { %v2610_v38 = vld [vmem:[%s2405_s23 + $0x8] sm:$0xff]  ;;  %894 = vmatprep.mubr.f32.mxu0 %v734_v34  ;;  %vm440_vm2 = vcmp.lt.s32.totalorder %v2555_v12, 111  ;;  %v2651_v55 = vld [vmem:[%s3651_s4 + $0x10] ss:$0 sm:$0xff]  ;;  %vm338_vm3 = vcmp.lt.s32.totalorder %v2555_v12, 16  ;;  %vm321_vm5 = vcmp.lt.s32.totalorder %v2555_v12, 17 }
  0x43   : > { %569 = vrot.lane.b32.xlu1 %v2428_v3, %s2226_s26  ;;  %v2574_v18 = vrot.slane %v2561_v14, %v377_v13  ;;  %v2577_v19 = vrot.slane %v2566_v17, %v377_v13  ;;  %v2620_v44 = vrot.slane %v2566_v17, %v360_v33  ;;  %v2628_v47 = vrot.slane %v2561_v14, %v360_v33  ;;  %s3703_s12 = sand.u32 1, %s2187_s22   ;;  %s2236_s19 = smov [#allocation5]  }
  0x44   : > { %571 = vrot.lane.b32.xlu0 %v2430_v4, %s2226_s26  ;;  %vm423_vm6 = vcmp.lt.s32.totalorder %v2555_v12, 112  ;;  %vm406_vm7 = vcmp.lt.s32.totalorder %v2555_v12, 113  ;;  %vm389_vm8 = vcmp.lt.s32.totalorder %v2555_v12, 127  ;;  %vm1152_vm9 = vcmask 588800   ;;  %v755_v12 = vld [vmem:[%s3649_s2 + $0xb0] sm:$0xff]  ;;  %s3538_s23 = scalar_lea.sflag [#allocation6], %s3703_s12 }
  0x45   : > { %s2081_s20 = sshll.u32 %s2236_s19, 4  ;;  %s2082_s20 = int_to_ptr.vmem [resolvable:$false] %s2081_s20 }
  0x47   : > { %567 = vrot.lane.b32.xlu1 %v2436_v5, %s2226_s26 }
  0x48   : > { %559 = vrot.lane.b32.xlu0 %v2438_v6, %s2226_s26 }
  0x4b   : > { %565 = vrot.lane.b32.xlu1 %v2444_v7, %s2226_s26 }
  0x4c   : > { %557 = vrot.lane.b32.xlu0 %v2446_v8, %s2226_s26 }
  0x4f   : > { %539 = vrot.lane.b32.xlu1 %v2430_v4, %s2227_s30 }
  0x50   : > { %531 = vrot.lane.b32.xlu0 %v2422_v2, %s2227_s30 }
  0x53   : > { %699 = vrot.lane.b32.xlu1 %v2430_v4, %s2228_s10 }
  0x54   : > { %691 = vrot.lane.b32.xlu0 %v2422_v2, %s2228_s10 }
  0x57   : > { %537 = vrot.lane.b32.xlu1 %v2428_v3, %s2227_s30 }
  0x58   : > { %529 = vrot.lane.b32.xlu0 %v2420_v1, %s2227_s30 }
  0x5b   : > { %697 = vrot.lane.b32.xlu1 %v2428_v3, %s2228_s10 }
  0x5c   : > { %689 = vrot.lane.b32.xlu0 %v2420_v1, %s2228_s10 }
  0x5f   : > { %535 = vrot.lane.b32.xlu1 %v2436_v5, %s2227_s30 }
  0x60   : > { %527 = vrot.lane.b32.xlu0 %v2438_v6, %s2227_s30 }
  0x63   : > { %695 = vrot.lane.b32.xlu1 %v2436_v5, %s2228_s10 }
  0x64   : > { %687 = vrot.lane.b32.xlu0 %v2438_v6, %s2228_s10 }
  0x67   : > { %533 = vrot.lane.b32.xlu1 %v2444_v7, %s2227_s30 }
  0x68   : > { %525 = vrot.lane.b32.xlu0 %v2446_v8, %s2227_s30 }
  0x6b   : > { %693 = vrot.lane.b32.xlu1 %v2444_v7, %s2228_s10 }
  0x6c   : > { %685 = vrot.lane.b32.xlu0 %v2446_v8, %s2228_s10 }
  0x6f   : > { %507 = vrot.lane.b32.xlu1 %v2430_v4, %s2229_s11 }
  0x70   : > { %499 = vrot.lane.b32.xlu0 %v2422_v2, %s2229_s11 }
  0x73   : > { %505 = vrot.lane.b32.xlu1 %v2428_v3, %s2229_s11 }
  0x74   : > { %497 = vrot.lane.b32.xlu0 %v2420_v1, %s2229_s11 }
  0x77   : > { %503 = vrot.lane.b32.xlu1 %v2436_v5, %s2229_s11 }
  0x78   : > { %495 = vrot.lane.b32.xlu0 %v2438_v6, %s2229_s11 }
  0x7b   : > { %501 = vrot.lane.b32.xlu1 %v2444_v7, %s2229_s11 }
  0x7c   : > { %493 = vrot.lane.b32.xlu0 %v2446_v8, %s2229_s11 }
  0x7f   : > { %475 = vrot.lane.b32.xlu1 %v2430_v4, %s2230_s9 }
  0x80   : > { %467 = vrot.lane.b32.xlu0 %v2422_v2, %s2230_s9 }
  0x83   : > { %473 = vrot.lane.b32.xlu1 %v2428_v3, %s2230_s9 }
  0x84   : > { %465 = vrot.lane.b32.xlu0 %v2420_v1, %s2230_s9 }
  0x87   : > { %471 = vrot.lane.b32.xlu1 %v2436_v5, %s2230_s9 }
  0x88   : > { %463 = vrot.lane.b32.xlu0 %v2438_v6, %s2230_s9 }
  0x8b   : > { %469 = vrot.lane.b32.xlu1 %v2444_v7, %s2230_s9 }
  0x8c   : > { %461 = vrot.lane.b32.xlu0 %v2446_v8, %s2230_s9 }
  0x8f   : > { %667 = vrot.lane.b32.xlu1 %v2430_v4, %s2231_s14 }
  0x90   : > { %659 = vrot.lane.b32.xlu0 %v2422_v2, %s2231_s14 }
  0x93   : > { %665 = vrot.lane.b32.xlu1 %v2428_v3, %s2231_s14 }
  0x94   : > { %657 = vrot.lane.b32.xlu0 %v2420_v1, %s2231_s14 }
  0x97   : > { %663 = vrot.lane.b32.xlu1 %v2436_v5, %s2231_s14 }
  0x98   : > { %655 = vrot.lane.b32.xlu0 %v2438_v6, %s2231_s14 }
  0x9b   : > { %661 = vrot.lane.b32.xlu1 %v2444_v7, %s2231_s14 }
  0x9c   : > { %653 = vrot.lane.b32.xlu0 %v2446_v8, %s2231_s14 }
  0x9f   : > { %635 = vrot.lane.b32.xlu1 %v2430_v4, %s2233_s16 }
  0xa0   : > { %627 = vrot.lane.b32.xlu0 %v2422_v2, %s2233_s16 }
  0xa3   : > { %633 = vrot.lane.b32.xlu1 %v2428_v3, %s2233_s16 }
  0xa4   : > { %625 = vrot.lane.b32.xlu0 %v2420_v1, %s2233_s16 }
  0xa7   : > { %631 = vrot.lane.b32.xlu1 %v2436_v5, %s2233_s16 }
  0xa8   : > { %623 = vrot.lane.b32.xlu0 %v2438_v6, %s2233_s16 }
  0xab   : > { %629 = vrot.lane.b32.xlu1 %v2444_v7, %s2233_s16 }
  0xac   : > { %621 = vrot.lane.b32.xlu0 %v2446_v8, %s2233_s16 }
  0xaf   : > { %603 = vrot.lane.b32.xlu1 %v2430_v4, %s2234_s17 }
  0xb0   : > { %595 = vrot.lane.b32.xlu0 %v2422_v2, %s2234_s17 }
  0xb1   : > { %v562_v15 = vpop.permute.xlu1 %561 }
  0xb2   : > { %v564_v16 = vpop.permute.xlu0 %563 }
  0xb3   : > { %601 = vrot.lane.b32.xlu1 %v2428_v3, %s2234_s17 }
  0xb4   : > { %593 = vrot.lane.b32.xlu0 %v2420_v1, %s2234_s17 }
  0xb5   : > { %v570_v20 = vpop.permute.xlu1 %569 }
  0xb6   : > { %v572_v21 = vpop.permute.xlu0 %571  ;;  %v575_v24 = vsel %vm372_vm0, %v562_v15, %v570_v20  ;;  %v579_v26 = vsel %vm372_vm0, %v570_v20, %v562_v15 }
  0xb7   : > { %v580_v22 = vsel %vm372_vm0, %v572_v21, %v564_v16  ;;  %v576_v23 = vsel %vm372_vm0, %v564_v16, %v572_v21  ;;  %599 = vrot.lane.b32.xlu1 %v2436_v5, %s2234_s17  ;;  %v586_v30 = vmul.f32 %v575_v24, %v2574_v18  ;;  %v585_v35 = vmul.f32 %v579_v26, %v2577_v19 }
  0xb8   : > { %591 = vrot.lane.b32.xlu0 %v2438_v6, %s2234_s17  ;;  %v588_v25 = vmul.f32 %v576_v23, %v2574_v18  ;;  %v587_v27 = vmul.f32 %v580_v22, %v2577_v19 }
  0xb9   : > { %v568_v28 = vpop.permute.xlu1 %567 }
  0xba   : > { %v560_v29 = vpop.permute.xlu0 %559  ;;  %830 = vmatprep.subr.mxu0 %v588_v25 }
  0xbb   : > { %v574_v31 = vsel %vm372_vm0, %v560_v29, %v568_v28  ;;  %v578_v32 = vsel %vm372_vm0, %v568_v28, %v560_v29  ;;  %831 = vmatpush1.msra.mxu0 %v587_v27  ;;  %597 = vrot.lane.b32.xlu1 %v2444_v7, %s2234_s17 }
  0xbc   : > { %v583_v36 = vmul.f32 %v578_v32, %v2577_v19  ;;  %v584_v37 = vmul.f32 %v574_v31, %v2574_v18  ;;  %589 = vrot.lane.b32.xlu0 %v2446_v8, %s2234_s17  ;;  %832 = vmatprep.subr.mxu0 %v586_v30 }
  0xbd   : > { %833 = vmatpush1.msra.mxu0 %v585_v35  ;;  %v566_v39 = vpop.permute.xlu1 %565 }
  0xbe   : > { %v558_v40 = vpop.permute.xlu0 %557  ;;  %834 = vmatprep.subr.mxu0 %v584_v37 }
  0xbf   : > { %v573_v42 = vsel %vm372_vm0, %v558_v40, %v566_v39  ;;  %v577_v43 = vsel %vm372_vm0, %v566_v39, %v558_v40  ;;  %835 = vmatpush1.msra.mxu0 %v583_v36  ;;  %438 = vrot.lane.b32.xlu1 %v2610_v38, %s2228_s10 }
  0xc0   : > { %v581_v45 = vmul.f32 %v577_v43, %v2577_v19  ;;  %v582_v46 = vmul.f32 %v573_v42, %v2574_v18  ;;  %436 = vrot.lane.b32.xlu0 %v2613_v41, %s2228_s10 }
  0xc1   : > { %v540_v48 = vpop.permute.xlu1 %539 }
  0xc2   : > { %v532_v49 = vpop.permute.xlu0 %531  ;;  %836 = vmatprep.subr.mxu0 %v582_v46  ;;  %v343_v46 = vsub.s32 1, %v2549_v11 }
  0xc3   : > { %v544_v50 = vsel %vm355_vm1, %v532_v49, %v540_v48  ;;  %v548_v51 = vsel %vm355_vm1, %v540_v48, %v532_v49  ;;  %837 = vmatpush1.msra.mxu0 %v581_v45  ;;  %421 = vrot.lane.b32.xlu1 %v2610_v38, %s2231_s14 }
  0xc4   : > { %v555_v52 = vmul.f32 %v548_v51, %v2620_v44  ;;  %v556_v53 = vmul.f32 %v544_v50, %v2628_v47  ;;  %419 = vrot.lane.b32.xlu0 %v2613_v41, %s2231_s14  ;;  %s1703_s14 = sshll.u32 %s2409_s21, 4  ;;  %s3533_s14 = int_to_ptr.vmem [resolvable:$true] %s1703_s14 }
  0xc5   : > { %v700_v56 = vpop.permute.xlu1 %699  ;;  %s2077_s10 = scalar_lea.vmem %s3533_s14, 1024  ;;  %p2084_p11 = scmp.lt.s32.totalorder %s3533_s14, %s2082_s20 }
  0xc6   : > { %v692_v57 = vpop.permute.xlu0 %691  ;;  %838 = vmatprep.subr.mxu0 %v556_v53  ;;  %p2078_p8 = scmp.ne.s32.totalorder %s3533_s14, %s2077_s10 }
  0xc7   : > { %v704_v58 = vsel %vm440_vm2, %v692_v57, %v700_v56  ;;  %v708_v59 = vsel %vm440_vm2, %v700_v56, %v692_v57  ;;  %839 = vmatpush1.msra.mxu0 %v555_v52  ;;  %404 = vrot.lane.b32.xlu1 %v2610_v38, %s2233_s16  ;;  %v2744_v56 = vrot.slane %v2566_v17, %v343_v46 }
  0xc8   : > { %v2660_v60 = vmul.f32 %v2646_v54, %v708_v59  ;;  %v2663_v61 = vmul.f32 %v2651_v55, %v704_v58  ;;  %402 = vrot.lane.b32.xlu0 %v2613_v41, %s2233_s16  ;;  %v2747_v57 = vrot.slane %v2561_v14, %v343_v46  ;;  %v738_v58 = vld [vmem:[%s3649_s2 + $0x28] sm:$0xff]  ;;  %p2079_p9 = pnand %p2078_p8, %p2374_p12 }
  0xc9   : > { %v538_v62 = vpop.permute.xlu1 %537 }
  0xca   : > { %v530_v63 = vpop.permute.xlu0 %529  ;;  %1875 = vmatprep.subr.mxu1 %v2660_v60  ;;  %p2080_p10 = pneg %p2079_p9 }
  0xcb   : > { %v543_v0 = vsel %vm355_vm1, %v530_v63, %v538_v62  ;;  %v547_v10 = vsel %vm355_vm1, %v538_v62, %v530_v63  ;;  %1879 = vmatpush1.msra.mxu1 %v2663_v61  ;;  %387 = vrot.lane.b32.xlu1 %v2610_v38, %s2234_s17 }
  0xcc   : > { %v553_v13 = vmul.f32 %v547_v10, %v2620_v44  ;;  %v554_v15 = vmul.f32 %v543_v0, %v2628_v47  ;;  %385 = vrot.lane.b32.xlu0 %v2613_v41, %s2234_s17 }
  0xcd   : > { %v698_v16 = vpop.permute.xlu1 %697 }
  0xce   : > { %v690_v20 = vpop.permute.xlu0 %689  ;;  %840 = vmatprep.subr.mxu0 %v554_v15  ;;  %v741_v15 = vld [vmem:[%s3649_s2 + $0x40] sm:$0xff] }
  0xcf   : > { %v703_v21 = vsel %vm440_vm2, %v690_v20, %v698_v16  ;;  %v707_v22 = vsel %vm440_vm2, %v698_v16, %v690_v20  ;;  %841 = vmatpush1.msra.mxu0 %v553_v13  ;;  %370 = vrot.lane.b32.xlu1 %v2610_v38, %s2226_s26 }
  0xd0   : > { %v2684_v23 = vmul.f32 %v2651_v55, %v703_v21  ;;  %v2687_v24 = vmul.f32 %v2646_v54, %v707_v22  ;;  %368 = vrot.lane.b32.xlu0 %v2613_v41, %s2226_s26  ;;  %s2083_s26 = scalar_lea.vmem %s2082_s20, 2048 }
  0xd1   : > { %v536_v25 = vpop.permute.xlu1 %535  ;;  %p2085_p0 = scmp.lt.s32.totalorder %s2083_s26, %s2077_s10 }
  0xd2   : > { %v528_v26 = vpop.permute.xlu0 %527  ;;  %1876 = vmatprep.subr.mxu1 %v2687_v24 }
  0xd3   : > { %v542_v27 = vsel %vm355_vm1, %v528_v26, %v536_v25  ;;  %v546_v28 = vsel %vm355_vm1, %v536_v25, %v528_v26  ;;  %1880 = vmatpush1.msra.mxu1 %v2684_v23  ;;  %353 = vrot.lane.b32.xlu1 %v2610_v38, %s2227_s30  ;;  %p2086_p1 = por %p2085_p0, %p2084_p11 }
  0xd4   : > { %v551_v29 = vmul.f32 %v546_v28, %v2620_v44  ;;  %v552_v30 = vmul.f32 %v542_v27, %v2628_v47  ;;  %351 = vrot.lane.b32.xlu0 %v2613_v41, %s2227_s30  ;;  %v744_v27 = vld [vmem:[%s3649_s2 + $0x58] sm:$0xff] }
  0xd5   : > { %v696_v31 = vpop.permute.xlu1 %695  ;;  %p2087_p4 = pnand %p2086_p1, %p2080_p10 }
  0xd6   : > { %v688_v32 = vpop.permute.xlu0 %687  ;;  %842 = vmatprep.subr.mxu0 %v552_v30 }
  0xd7   : > { %v702_v33 = vsel %vm440_vm2, %v688_v32, %v696_v31  ;;  %v706_v34 = vsel %vm440_vm2, %v696_v31, %v688_v32  ;;  %843 = vmatpush1.msra.mxu0 %v551_v29  ;;  %336 = vrot.lane.b32.xlu1 %v2610_v38, %s2229_s11 }
  0xd8   : > { %v2710_v35 = vmul.f32 %v2651_v55, %v702_v33  ;;  %v2713_v36 = vmul.f32 %v2646_v54, %v706_v34  ;;  %334 = vrot.lane.b32.xlu0 %v2613_v41, %s2229_s11  ;;  %v326_v34 = vsub.s32 0, %v2549_v11 }
  0xd9   : > { %v534_v37 = vpop.permute.xlu1 %533 }
  0xda   : > { %v526_v39 = vpop.permute.xlu0 %525  ;;  %1877 = vmatprep.subr.mxu1 %v2713_v36 }
  0xdb   : > { %v541_v40 = vsel %vm355_vm1, %v526_v39, %v534_v37  ;;  %v545_v42 = vsel %vm355_vm1, %v534_v37, %v526_v39  ;;  %1881 = vmatpush1.msra.mxu1 %v2710_v35  ;;  %317 = vrot.lane.b32.xlu1 %v2610_v38, %s2230_s9  ;;  %v747_v37 = vld [vmem:[%s3649_s2 + $0x70] sm:$0xff] }
  0xdc   : > { %v549_v43 = vmul.f32 %v545_v42, %v2620_v44  ;;  %v550_v45 = vmul.f32 %v541_v40, %v2628_v47  ;;  %315 = vrot.lane.b32.xlu0 %v2613_v41, %s2230_s9  ;;  %s1874_s9 = sshll.u32 %s2211_s28, 10 }
  0xdd   : > { %v694_v48 = vpop.permute.xlu1 %693  ;;  %s3531_s13 = scalar_lea.hbm %s3653_s6, %s1874_s9 }
  0xde   : > { %v686_v49 = vpop.permute.xlu0 %685  ;;  %844 = vmatprep.subr.mxu0 %v550_v45 }
  0xdf   : > { %v701_v50 = vsel %vm440_vm2, %v686_v49, %v694_v48  ;;  %v705_v51 = vsel %vm440_vm2, %v694_v48, %v686_v49  ;;  %845 = vmatpush1.msra.mxu0 %v549_v43  ;;  %v2796_v48 = vrot.slane %v2566_v17, %v326_v34  ;;  %v2799_v49 = vrot.slane %v2561_v14, %v326_v34 }
  0xe0   : > { %v2738_v52 = vmul.f32 %v2651_v55, %v701_v50  ;;  %v2741_v53 = vmul.f32 %v2646_v54, %v705_v51  ;;  %v750_v50 = vld [vmem:[%s3649_s2 + $0x88] sm:$0xff] }
  0xe1   : > { %v508_v59 = vpop.permute.xlu1 %507 }
  0xe2   : > { %v500_v62 = vpop.permute.xlu0 %499  ;;  %1878 = vmatprep.subr.mxu1 %v2741_v53 }
  0xe3   : > { %v512_v63 = vsel %vm338_vm3, %v500_v62, %v508_v59  ;;  %v516_v0 = vsel %vm338_vm3, %v508_v59, %v500_v62  ;;  %1882 = vmatpush1.msra.mxu1 %v2738_v52 }
  0xe4   : > { %v523_v10 = vmul.f32 %v516_v0, %v2744_v56  ;;  %v524_v13 = vmul.f32 %v512_v63, %v2747_v57  ;;  %1834 = vmatmul.mubr.msk.f32.vlgmr.msra.gmra.mxu1 %vm781_vm4, %v738_v58 }
  0xe5   : > { %1067 = vmatprep.mubr.f32.mxu1 %v2232_v9  ;;  %v506_v16 = vpop.permute.xlu1 %505 }
  0xe6   : > { %v498_v20 = vpop.permute.xlu0 %497  ;;  %846 = vmatprep.subr.mxu0 %v524_v13 }
  0xe7   : > { %v511_v21 = vsel %vm338_vm3, %v498_v20, %v506_v16  ;;  %v515_v22 = vsel %vm338_vm3, %v506_v16, %v498_v20  ;;  %847 = vmatpush1.msra.mxu0 %v523_v10  ;;  %v753_v10 = vld [vmem:[%s3649_s2 + $0xa0] sm:$0xff] }
  0xe8   : > { %v521_v25 = vmul.f32 %v515_v22, %v2744_v56  ;;  %v522_v26 = vmul.f32 %v511_v21, %v2747_v57  ;;  %1835 = vmatmul.mubr.msk.f32.gmra.mxu1 %vm781_vm4, %v741_v15 }
  0xe9   : > { %1073 = vmatprep.mubr.f32.mxu1 %v2232_v9  ;;  %v504_v28 = vpop.permute.xlu1 %503 }
  0xea   : > { %v496_v29 = vpop.permute.xlu0 %495  ;;  %848 = vmatprep.subr.mxu0 %v522_v26 }
  0xeb   : > { %v510_v30 = vsel %vm338_vm3, %v496_v29, %v504_v28  ;;  %v514_v31 = vsel %vm338_vm3, %v504_v28, %v496_v29  ;;  %849 = vmatpush1.msra.mxu0 %v521_v25  ;;  %v756_v25 = vld [vmem:[%s3649_s2 + $0xb8] sm:$0xff] }
  0xec   : > { %v519_v32 = vmul.f32 %v514_v31, %v2744_v56  ;;  %v520_v33 = vmul.f32 %v510_v30, %v2747_v57  ;;  %1836 = vmatmul.mubr.msk.f32.gmra.mxu1 %vm781_vm4, %v744_v27 }
  0xed   : > { %1079 = vmatprep.mubr.f32.mxu1 %v2232_v9  ;;  %v502_v39 = vpop.permute.xlu1 %501 }
  0xee   : > { %v494_v40 = vpop.permute.xlu0 %493  ;;  %850 = vmatprep.subr.mxu0 %v520_v33  ;;  %v759_v33 = vld [vmem:[%s3649_s2 + $0xd0] sm:$0xff] }
  0xef   : > { %v509_v42 = vsel %vm338_vm3, %v494_v40, %v502_v39  ;;  %v513_v43 = vsel %vm338_vm3, %v502_v39, %v494_v40  ;;  %851 = vmatpush1.msra.mxu0 %v519_v32  ;;  %v428_v32 = vsub.s32 7, %v2549_v11 }
  0xf0   : > { %v517_v45 = vmul.f32 %v513_v43, %v2744_v56  ;;  %v518_v46 = vmul.f32 %v509_v42, %v2747_v57  ;;  %1837 = vmatmul.mubr.msk.f32.gmra.mxu1 %vm781_vm4, %v747_v37 }
  0xf1   : > { %1085 = vmatprep.mubr.f32.mxu1 %v2232_v9  ;;  %v476_v51 = vpop.permute.xlu1 %475 }
  0xf2   : > { %v468_v58 = vpop.permute.xlu0 %467  ;;  %852 = vmatprep.subr.mxu0 %v518_v46  ;;  %v2851_v46 = vrot.slane %v2561_v14, %v428_v32 }
  0xf3   : > { %v480_v59 = vsel %vm321_vm5, %v468_v58, %v476_v51  ;;  %v484_v62 = vsel %vm321_vm5, %v476_v51, %v468_v58  ;;  %853 = vmatpush1.msra.mxu0 %v517_v45  ;;  %v2848_v45 = vrot.slane %v2566_v17, %v428_v32  ;;  %v411_v32 = vsub.s32 6, %v2549_v11 }
  0xf4   : > { %v491_v63 = vmul.f32 %v484_v62, %v2796_v48  ;;  %v492_v0 = vmul.f32 %v480_v59, %v2799_v49  ;;  %1838 = vmatmul.mubr.msk.f32.gmra.mxu1 %vm781_vm4, %v750_v50  ;;  %v762_v50 = vld [vmem:[%s3649_s2 + $0xe8] sm:$0xff] }
  0xf5   : > { %1091 = vmatprep.mubr.f32.mxu1 %v2232_v9  ;;  %v474_v13 = vpop.permute.xlu1 %473 }
  0xf6   : > { %v466_v15 = vpop.permute.xlu0 %465  ;;  %854 = vmatprep.subr.mxu0 %v492_v0 }
  0xf7   : > { %v479_v16 = vsel %vm321_vm5, %v466_v15, %v474_v13  ;;  %v483_v20 = vsel %vm321_vm5, %v474_v13, %v466_v15  ;;  %855 = vmatpush1.msra.mxu0 %v491_v63 }
  0xf8   : > { %v489_v21 = vmul.f32 %v483_v20, %v2796_v48  ;;  %v490_v22 = vmul.f32 %v479_v16, %v2799_v49  ;;  %1839 = vmatmul.mubr.msk.f32.gmra.mxu1 %vm781_vm4, %v753_v10  ;;  %v765_v10 = vld [vmem:[%s3649_s2 + $0x100] sm:$0xff] }
  0xf9   : > { %1097 = vmatprep.mubr.f32.mxu1 %v2232_v9  ;;  %v472_v26 = vpop.permute.xlu1 %471 }
  0xfa   : > { %v464_v27 = vpop.permute.xlu0 %463  ;;  %856 = vmatprep.subr.mxu0 %v490_v22 }
  0xfb   : > { %v478_v28 = vsel %vm321_vm5, %v464_v27, %v472_v26  ;;  %v482_v29 = vsel %vm321_vm5, %v472_v26, %v464_v27  ;;  %857 = vmatpush1.msra.mxu0 %v489_v21 }
  0xfc   : > { %v487_v30 = vmul.f32 %v482_v29, %v2796_v48  ;;  %v488_v31 = vmul.f32 %v478_v28, %v2799_v49  ;;  %1840 = vmatmul.mubr.msk.f32.gmra.mxu1 %vm781_vm4, %v756_v25  ;;  %v768_v25 = vld [vmem:[%s3649_s2 + $0x118] sm:$0xff] }
  0xfd   : > { %1103 = vmatprep.mubr.f32.mxu1 %v2232_v9  ;;  %v470_v34 = vpop.permute.xlu1 %469 }
  0xfe   : > { %v462_v37 = vpop.permute.xlu0 %461  ;;  %858 = vmatprep.subr.mxu0 %v488_v31 }
  0xff   : > { %v477_v39 = vsel %vm321_vm5, %v462_v37, %v470_v34  ;;  %v481_v40 = vsel %vm321_vm5, %v470_v34, %v462_v37  ;;  %859 = vmatpush1.msra.mxu0 %v487_v30 }
 0x100   : > { %v485_v42 = vmul.f32 %v481_v40, %v2796_v48  ;;  %v486_v43 = vmul.f32 %v477_v39, %v2799_v49  ;;  %1841 = vmatmul.mubr.msk.f32.gmra.mxu1 %vm781_vm4, %v759_v33  ;;  %v771_v33 = vld [vmem:[%s3649_s2 + $0x130] sm:$0xff] }
 0x101   : > { %1109 = vmatprep.mubr.f32.mxu1 %v2232_v9  ;;  %v668_v51 = vpop.permute.xlu1 %667 }
 0x102   : > { %v660_v58 = vpop.permute.xlu0 %659  ;;  %860 = vmatprep.subr.mxu0 %v486_v43 }
 0x103   : > { %v672_v59 = vsel %vm423_vm6, %v660_v58, %v668_v51  ;;  %v676_v62 = vsel %vm423_vm6, %v668_v51, %v660_v58  ;;  %861 = vmatpush1.msra.mxu0 %v485_v42  ;;  %v2903_v51 = vrot.slane %v2561_v14, %v411_v32  ;;  %v774_v58 = vld [vmem:[%s3649_s2 + $0x148] sm:$0xff] }
 0x104   : > { %v683_v63 = vmul.f32 %v672_v59, %v2848_v45  ;;  %v684_v0 = vmul.f32 %v676_v62, %v2851_v46  ;;  %1842 = vmatmul.mubr.msk.f32.gmra.mxu1 %vm781_vm4, %v762_v50  ;;  %v2900_v50 = vrot.slane %v2566_v17, %v411_v32  ;;  %v1363_v59 = vld [vmem:[%s3650_s3 + $0x8] sm:$0xff]  ;;  %v1366_v32 = vld [vmem:[%s3650_s3 + $0x20] sm:$0xff] }
 0x105   : > { %1115 = vmatprep.mubr.f32.mxu1 %v2232_v9  ;;  %v666_v13 = vpop.permute.xlu1 %665 }
 0x106   : > { %v658_v15 = vpop.permute.xlu0 %657  ;;  %862 = vmatprep.subr.mxu0 %v684_v0  ;;  %v2235_v0 = vmov 0  }
 0x107   : > { %v671_v16 = vsel %vm423_vm6, %v658_v15, %v666_v13  ;;  %v675_v20 = vsel %vm423_vm6, %v666_v13, %v658_v15  ;;  %863 = vmatpush2.msra.mxu0 %v683_v63  ;;  %1996 = vset.pattern.permute.xlu1 %v2235_v0 }
 0x108   : > { %v681_v21 = vmul.f32 %v671_v16, %v2848_v45  ;;  %v682_v22 = vmul.f32 %v675_v20, %v2851_v46  ;;  %1843 = vmatmul.mubr.msk.f32.gmra.mxu1 %vm781_vm4, %v765_v10  ;;  %v1362_v10 = vld [vmem:[%s3650_s3] sm:$0xff]  ;;  %1385 = vperm.xlu1 %1996, %v1363_v59   ;;  %v394_v59 = vsub.s32 5, %v2549_v11 }
 0x109   : > { %1121 = vmatprep.mubr.f32.mxu1 %v2232_v9  ;;  %v664_v26 = vpop.permute.xlu1 %663  ;;  %1995 = vset.pattern.permute.xlu0 %v2235_v0 }
 0x10a   : > { %v656_v27 = vpop.permute.xlu0 %655  ;;  %864 = vmatprep.subr.mxu0 %v682_v22  ;;  %v777_v22 = vld [vmem:[%s3649_s2 + $0x160] sm:$0xff]  ;;  %1380 = vperm.xlu0 %1995, %v1362_v10   ;;  %v1369_v10 = vld [vmem:[%s3650_s3 + $0x38] sm:$0xff] }
 0x10b   : > { %v670_v28 = vsel %vm423_vm6, %v656_v27, %v664_v26  ;;  %v674_v29 = vsel %vm423_vm6, %v664_v26, %v656_v27  ;;  %865 = vmatpush2.msra.mxu0 %v681_v21  ;;  %v1364_v21 = vld [vmem:[%s3650_s3 + $0x10] sm:$0xff]  ;;  %v1365_v27 = vld [vmem:[%s3650_s3 + $0x18] sm:$0xff] }
 0x10c   : > { %v679_v30 = vmul.f32 %v670_v28, %v2848_v45  ;;  %v680_v31 = vmul.f32 %v674_v29, %v2851_v46  ;;  %1844 = vmatmul.mubr.msk.f32.gmra.mxu1 %vm781_vm4, %v768_v25  ;;  %1390 = vperm.xlu1 %1996, %v1364_v21   ;;  %v2976_v21 = vrot.slane %v2561_v14, %v394_v59 }
 0x10d   : > { %1127 = vmatprep.mubr.f32.mxu1 %v2232_v9  ;;  %v662_v34 = vpop.permute.xlu1 %661 }
 0x10e   : > { %v654_v37 = vpop.permute.xlu0 %653  ;;  %866 = vmatprep.subr.mxu0 %v680_v31  ;;  %1395 = vperm.xlu0 %1995, %v1365_v27   ;;  %v1375_v27 = vld [vmem:[%s3650_s3 + $0x68] sm:$0xff] }
 0x10f   : > { %v669_v39 = vsel %vm423_vm6, %v654_v37, %v662_v34  ;;  %v673_v40 = vsel %vm423_vm6, %v662_v34, %v654_v37  ;;  %867 = vmatpush2.msra.mxu0 %v679_v30 }
 0x110   : > { %v677_v42 = vmul.f32 %v669_v39, %v2848_v45  ;;  %v678_v43 = vmul.f32 %v673_v40, %v2851_v46  ;;  %1845 = vmatmul.mubr.msk.f32.gmra.mxu1 %vm781_vm4, %v771_v33  ;;  %v780_v33 = vld [vmem:[%s3649_s2 + $0x178] sm:$0xff]  ;;  %v1367_v39 = vld [vmem:[%s3650_s3 + $0x28] sm:$0xff]  ;;  %1400 = vperm.xlu1 %1996, %v1366_v32  }
 0x111   : > { %1133 = vmatprep.mubr.f32.mxu1 %v2232_v9  ;;  %v636_v62 = vpop.permute.xlu1 %635 }
 0x112   : > { %v628_v63 = vpop.permute.xlu0 %627  ;;  %868 = vmatprep.subr.mxu0 %v678_v43  ;;  %1405 = vperm.xlu0 %1995, %v1367_v39  }
 0x113   : > { %v640_v13 = vsel %vm406_vm7, %v628_v63, %v636_v62  ;;  %v644_v15 = vsel %vm406_vm7, %v636_v62, %v628_v63  ;;  %869 = vmatpush2.msra.mxu0 %v677_v42  ;;  %v1368_v62 = vld [vmem:[%s3650_s3 + $0x30] sm:$0xff] }
 0x114   : > { %v651_v16 = vmul.f32 %v640_v13, %v2900_v50  ;;  %v652_v20 = vmul.f32 %v644_v15, %v2903_v51  ;;  %1846 = vmatmul.mubr.msk.f32.gmra.mxu1 %vm781_vm4, %v774_v58  ;;  %1410 = vperm.xlu1 %1996, %v1368_v62  }
 0x115   : > { %1139 = vmatprep.mubr.f32.mxu1 %v2232_v9  ;;  %v634_v25 = vpop.permute.xlu1 %633 }
 0x116   : > { %v626_v26 = vpop.permute.xlu0 %625  ;;  %870 = vmatprep.subr.mxu0 %v652_v20  ;;  %v2973_v20 = vrot.slane %v2566_v17, %v394_v59  ;;  %1415 = vperm.xlu0 %1995, %v1369_v10   ;;  %v1371_v59 = vld [vmem:[%s3650_s3 + $0x48] sm:$0xff] }
 0x117   : > { %v639_v28 = vsel %vm406_vm7, %v626_v26, %v634_v25  ;;  %v643_v29 = vsel %vm406_vm7, %v634_v25, %v626_v26  ;;  %871 = vmatpush2.msra.mxu0 %v651_v16 }
 0x118   : > { %v649_v30 = vmul.f32 %v639_v28, %v2900_v50  ;;  %v650_v31 = vmul.f32 %v643_v29, %v2903_v51  ;;  %1847 = vmatmul.mubr.msk.f32.gmra.mxu1 %vm781_vm4, %v777_v22  ;;  %v1374_v22 = vld [vmem:[%s3650_s3 + $0x60] sm:$0xff] }
 0x119   : > { %1145 = vmatprep.mubr.f32.mxu1 %v2232_v9  ;;  %v632_v34 = vpop.permute.xlu1 %631  ;;  %1440 = vperm.xlu1 %1996, %v1374_v22  }
 0x11a   : > { %v624_v37 = vpop.permute.xlu0 %623  ;;  %872 = vmatprep.subr.mxu0 %v650_v31  ;;  %1445 = vperm.xlu0 %1995, %v1375_v27  }
 0x11b   : > { %v638_v40 = vsel %vm406_vm7, %v624_v37, %v632_v34  ;;  %v642_v42 = vsel %vm406_vm7, %v632_v34, %v624_v37  ;;  %873 = vmatpush2.msra.mxu0 %v649_v30  ;;  %v1376_v30 = vld [vmem:[%s3650_s3 + $0x70] sm:$0xff] }
 0x11c   : > { %v647_v43 = vmul.f32 %v638_v40, %v2900_v50  ;;  %v648_v58 = vmul.f32 %v642_v42, %v2903_v51  ;;  %1848 = vmatmul.mubr.msk.f32.gmra.mxu1 %vm781_vm4, %v780_v33  ;;  %v1377_v33 = vld [vmem:[%s3650_s3 + $0x78] sm:$0xff]  ;;  %v1370_v42 = vld [vmem:[%s3650_s3 + $0x40] sm:$0xff] }
 0x11d   : > { %1265 = vmatprep.mubr.f32.mxu1 %v2232_v9  ;;  %v630_v63 = vpop.permute.xlu1 %629  ;;  %1450 = vperm.xlu1 %1996, %v1376_v30  }
 0x11e   : > { %v622_v0 = vpop.permute.xlu0 %621  ;;  %874 = vmatprep.subr.mxu0 %v648_v58  ;;  %1455 = vperm.xlu0 %1995, %v1377_v33  }
 0x11f   : > { %v637_v13 = vsel %vm406_vm7, %v622_v0, %v630_v63  ;;  %v641_v11 = vsel %vm406_vm7, %v630_v63, %v622_v0  ;;  %875 = vmatpush2.msra.mxu0 %v647_v43 }
 0x120   : > { %v645_v15 = vmul.f32 %v637_v13, %v2900_v50  ;;  %v646_v16 = vmul.f32 %v641_v11, %v2903_v51  ;;  %v1372_v13 = vld [vmem:[%s3650_s3 + $0x50] sm:$0xff] }
 0x121   : > { %v604_v25 = vpop.permute.xlu1 %603  ;;  %1420 = vperm.xlu1 %1996, %v1370_v42   ;;  %v743_v42 = vld [vmem:[%s3649_s2 + $0x50] sm:$0xff] }
 0x122   : > { %v596_v26 = vpop.permute.xlu0 %595  ;;  %876 = vmatprep.subr.mxu0 %v646_v16  ;;  %1425 = vperm.xlu0 %1995, %v1371_v59   ;;  %v1373_v16 = vld [vmem:[%s3650_s3 + $0x58] sm:$0xff] }
 0x123   : > { %v608_v28 = vsel %vm389_vm8, %v596_v26, %v604_v25  ;;  %v612_v17 = vsel %vm389_vm8, %v604_v25, %v596_v26  ;;  %877 = vmatpush2.msra.mxu0 %v645_v15 }
 0x124   : > { %v619_v14 = vmul.f32 %v608_v28, %v2973_v20  ;;  %v620_v29 = vmul.f32 %v612_v17, %v2976_v21 }
 0x125   : > { %v602_v31 = vpop.permute.xlu1 %601  ;;  %1430 = vperm.xlu1 %1996, %v1372_v13  }
 0x126   : > { %v594_v32 = vpop.permute.xlu0 %593  ;;  %878 = vmatprep.subr.mxu0 %v620_v29  ;;  %1435 = vperm.xlu0 %1995, %v1373_v16  }
 0x127   : > { %v607_v34 = vsel %vm389_vm8, %v594_v32, %v602_v31  ;;  %v611_v37 = vsel %vm389_vm8, %v602_v31, %v594_v32  ;;  %879 = vmatpush2.msra.mxu0 %v619_v14 }
 0x128   : > { %v617_v39 = vmul.f32 %v607_v34, %v2973_v20  ;;  %v618_v40 = vmul.f32 %v611_v37, %v2976_v21 }
 0x129   : > { %v600_v43 = vpop.permute.xlu1 %599 }
 0x12a   : > { %v592_v58 = vpop.permute.xlu0 %591  ;;  %880 = vmatprep.subr.mxu0 %v618_v40 }
 0x12b   : > { %v606_v62 = vsel %vm389_vm8, %v592_v58, %v600_v43  ;;  %v610_v63 = vsel %vm389_vm8, %v600_v43, %v592_v58  ;;  %881 = vmatpush2.msra.mxu0 %v617_v39  ;;  %v740_v39 = vld [vmem:[%s3649_s2 + $0x38] sm:$0xff]  ;;  %v742_v43 = vld [vmem:[%s3649_s2 + $0x48] sm:$0xff] }
 0x12c   : > { %v615_v0 = vmul.f32 %v606_v62, %v2973_v20  ;;  %v616_v10 = vmul.f32 %v610_v63, %v2976_v21  ;;  %v746_v58 = vld [vmem:[%s3649_s2 + $0x68] sm:$0xff]  ;;  %v745_v63 = vld [vmem:[%s3649_s2 + $0x60] sm:$0xff] }
 0x12d   : > { %v598_v11 = vpop.permute.xlu1 %597 }
 0x12e   : > { %v590_v15 = vpop.permute.xlu0 %589  ;;  %882 = vmatprep.subr.mxu0 %v616_v10 }
 0x12f   : > { %v605_v22 = vsel %vm389_vm8, %v590_v15, %v598_v11  ;;  %v609_v25 = vsel %vm389_vm8, %v598_v11, %v590_v15  ;;  %883 = vmatpush2.msra.mxu0 %v615_v0  ;;  %v749_v0 = vld [vmem:[%s3649_s2 + $0x80] sm:$0xff]  ;;  %v748_v15 = vld [vmem:[%s3649_s2 + $0x78] sm:$0xff] }
 0x130   : > { %v613_v26 = vmul.f32 %v605_v22, %v2973_v20  ;;  %v614_v27 = vmul.f32 %v609_v25, %v2976_v21  ;;  %v752_v22 = vld [vmem:[%s3649_s2 + $0x98] sm:$0xff] }
 0x131   : > { %v439_v28 = vpop.permute.xlu1 %438 }
 0x132   : > { %884 = vmatprep.subr.mxu0 %v614_v27  ;;  %v437_v17 = vpop.permute.xlu0 %436 }
 0x133   : > { %885 = vmatpush2.msra.mxu0 %v613_v26  ;;  %v441_v14 = vsel %vm440_vm2, %v437_v17, %v439_v28  ;;  %v442_v29 = vsel %vm440_vm2, %v439_v28, %v437_v17  ;;  %v751_v28 = vld [vmem:[%s3649_s2 + $0x90] sm:$0xff]  ;;  %v717_v17 = vld [vmem:[%s3648_s1] sm:$0xff] }
 0x134   : > { %886 = vmatprep.subr.mxu0 %v2430_v4  ;;  %v451_v30 = vmul.f32 %v2651_v55, %v441_v14  ;;  %v452_v31 = vmul.f32 %v2646_v54, %v442_v29  ;;  %v758_v14 = vld [vmem:[%s3649_s2 + $0xc8] sm:$0xff]  ;;  %v757_v29 = vld [vmem:[%s3649_s2 + $0xc0] sm:$0xff] }
 0x135   : > { %887 = vmatpush2.msra.mxu0 %v2422_v2  ;;  %v422_v32 = vpop.permute.xlu1 %421 }
 0x136   : > { %888 = vmatprep.subr.mxu0 %v2428_v3  ;;  %v420_v33 = vpop.permute.xlu0 %419  ;;  %1215 = vmatprep.subr.mxu1 %v452_v31  ;;  %v733_v3 = vld [vmem:[%s3649_s2] sm:$0xff] }
 0x137   : > { %889 = vmatpush2.msra.mxu0 %v2420_v1  ;;  %v424_v34 = vsel %vm423_vm6, %v420_v33, %v422_v32  ;;  %v425_v37 = vsel %vm423_vm6, %v422_v32, %v420_v33  ;;  %1216 = vmatpush1.msra.mxu1 %v451_v30  ;;  %v719_v30 = vld [vmem:[%s3648_s1 + $0x10] sm:$0xff]  ;;  %v761_v31 = vld [vmem:[%s3649_s2 + $0xe0] sm:$0xff]  ;;  %v760_v32 = vld [vmem:[%s3649_s2 + $0xd8] sm:$0xff] }
 0x138   : > { %890 = vmatprep.subr.mxu0 %v2436_v5  ;;  %v434_v4 = vmul.f32 %v2848_v45, %v424_v34  ;;  %v435_v2 = vmul.f32 %v2851_v46, %v425_v37  ;;  %v737_v5 = vld [vmem:[%s3649_s2 + $0x20] sm:$0xff]  ;;  %v720_v33 = vld [vmem:[%s3648_s1 + $0x18] sm:$0xff]  ;;  %v763_v37 = vld [vmem:[%s3649_s2 + $0xf0] sm:$0xff] }
 0x139   : > { %891 = vmatpush2.msra.mxu0 %v2438_v6  ;;  %v405_v1 = vpop.permute.xlu1 %404  ;;  %v764_v34 = vld [vmem:[%s3649_s2 + $0xf8] sm:$0xff] }
 0x13a   : > { %892 = vmatprep.subr.mxu0 %v2444_v7  ;;  %v403_v54 = vpop.permute.xlu0 %402  ;;  %1217 = vmatprep.subr.mxu1 %v435_v2  ;;  %v736_v7 = vld [vmem:[%s3649_s2 + $0x18] sm:$0xff]  ;;  %v767_v2 = vld [vmem:[%s3649_s2 + $0x110] sm:$0xff] }
 0x13b   : > { %893 = vmatpush2.msra.mxu0 %v2446_v8  ;;  %v407_v55 = vsel %vm406_vm7, %v403_v54, %v405_v1  ;;  %v408_v6 = vsel %vm406_vm7, %v405_v1, %v403_v54  ;;  %1218 = vmatpush1.msra.mxu1 %v434_v4  ;;  %v721_v4 = vld [vmem:[%s3648_s1 + $0x20] sm:$0xff]  ;;  %v722_v1 = vld [vmem:[%s3648_s1 + $0x28] sm:$0xff] }
 0x13c   : > { %895 = vmatmul.mubr.f32.vlgmr.msra.gmra.mxu0 %v733_v3  ;;  %1015 = vmatprep.subr.mxu0 %v2660_v60  ;;  %v418_v45 = vmul.f32 %v2903_v51, %v408_v6  ;;  %v417_v8 = vmul.f32 %v2900_v50, %v407_v55  ;;  %v766_v3 = vld [vmem:[%s3649_s2 + $0x108] sm:$0xff]  ;;  %v723_v55 = vld [vmem:[%s3648_s1 + $0x30] sm:$0xff]  ;;  %v773_v6 = vld [vmem:[%s3649_s2 + $0x140] sm:$0xff] }
 0x13d   : > { %1016 = vmatpush1.msra.mxu0 %v2663_v61  ;;  %v388_v46 = vpop.permute.xlu1 %387  ;;  %900 = vmatprep.mubr.f32.mxu0 %v737_v5  ;;  %v770_v54 = vld [vmem:[%s3649_s2 + $0x128] sm:$0xff]  ;;  %v769_v5 = vld [vmem:[%s3649_s2 + $0x120] sm:$0xff] }
 0x13e   : > { %1017 = vmatprep.subr.mxu0 %v2687_v24  ;;  %v386_v60 = vpop.permute.xlu0 %385  ;;  %1219 = vmatprep.subr.mxu1 %v418_v45  ;;  %v772_v45 = vld [vmem:[%s3649_s2 + $0x138] sm:$0xff] }
 0x13f   : > { %1018 = vmatpush1.msra.mxu0 %v2684_v23  ;;  %v390_v61 = vsel %vm389_vm8, %v386_v60, %v388_v46  ;;  %v391_v51 = vsel %vm389_vm8, %v388_v46, %v386_v60  ;;  %v739_v23 = vld [vmem:[%s3649_s2 + $0x30] sm:$0xff]  ;;  %1220 = vmatpush1.msra.mxu1 %v417_v8  ;;  %v776_v8 = vld [vmem:[%s3649_s2 + $0x158] sm:$0xff] }
 0x140   : > { %901 = vmatmul.mubr.f32.gmra.mxu0 %v736_v7  ;;  %1019 = vmatprep.subr.mxu0 %v2713_v36  ;;  %v400_v24 = vmul.f32 %v2973_v20, %v390_v61  ;;  %v401_v50 = vmul.f32 %v2976_v21, %v391_v51  ;;  %v724_v7 = vld [vmem:[%s3648_s1 + $0x38] sm:$0xff]  ;;  %v775_v46 = vld [vmem:[%s3649_s2 + $0x150] sm:$0xff]  ;;  %v778_v61 = vld [vmem:[%s3649_s2 + $0x168] sm:$0xff] }
 0x141   : > { %1020 = vmatpush1.msra.mxu0 %v2710_v35  ;;  %906 = vmatprep.mubr.f32.mxu0 %v740_v39  ;;  %v371_v40 = vpop.permute.xlu1 %370  ;;  %v725_v39 = vld [vmem:[%s3648_s1 + $0x40] sm:$0xff]  ;;  %v779_v60 = vld [vmem:[%s3649_s2 + $0x170] sm:$0xff]  ;;  %v726_v51 = vld [vmem:[%s3648_s1 + $0x48] sm:$0xff] }
 0x142   : > { %1021 = vmatprep.subr.mxu0 %v2741_v53  ;;  %v369_v36 = vpop.permute.xlu0 %368  ;;  %1221 = vmatprep.subr.mxu1 %v401_v50  ;;  %v727_v50 = vld [vmem:[%s3648_s1 + $0x50] sm:$0xff] }
 0x143   : > { %1022 = vmatpush1.msra.mxu0 %v2738_v52  ;;  %v373_v35 = vsel %vm372_vm0, %v369_v36, %v371_v40  ;;  %v374_v20 = vsel %vm372_vm0, %v371_v40, %v369_v36  ;;  %1222 = vmatpush1.msra.mxu1 %v400_v24  ;;  %v735_v24 = vld [vmem:[%s3649_s2 + $0x10] sm:$0xff]  ;;  %v729_v40 = vld [vmem:[%s3648_s1 + $0x60] sm:$0xff] }
 0x144   : > { %907 = vmatmul.mubr.f32.gmra.mxu0 %v739_v23  ;;  %v383_v21 = vmul.f32 %v2577_v19, %v374_v20  ;;  %v384_v53 = vmul.f32 %v2574_v18, %v373_v35  ;;  %1223 = vmatprep.subr.mxu1 %v2610_v38  ;;  %v728_v23 = vld [vmem:[%s3648_s1 + $0x58] sm:$0xff]  ;;  %v731_v36 = vld [vmem:[%s3648_s1 + $0x70] sm:$0xff] }
 0x145   : > { %912 = vmatprep.mubr.f32.mxu0 %v743_v42  ;;  %v354_v52 = vpop.permute.xlu1 %353  ;;  %1224 = vmatpush1.msra.mxu1 %v2613_v41  ;;  %v730_v42 = vld [vmem:[%s3648_s1 + $0x68] sm:$0xff]  ;;  %v732_v35 = vld [vmem:[%s3648_s1 + $0x78] sm:$0xff] }
 0x146   : > { %v352_v59 = vpop.permute.xlu0 %351  ;;  %1225 = vmatprep.subr.mxu1 %v384_v53 }
 0x147   : > { %v356_v19 = vsel %vm355_vm1, %v352_v59, %v354_v52  ;;  %v357_v18 = vsel %vm355_vm1, %v354_v52, %v352_v59  ;;  %1226 = vmatpush1.msra.mxu1 %v383_v21 }
 0x148   : > { %913 = vmatmul.mubr.f32.gmra.mxu0 %v742_v43  ;;  %v366_v62 = vmul.f32 %v2620_v44, %v357_v18  ;;  %v367_v38 = vmul.f32 %v2628_v47, %v356_v19 }
 0x149   : > { %918 = vmatprep.mubr.f32.mxu0 %v746_v58  ;;  %v337_v41 = vpop.permute.xlu1 %336 }
 0x14a   : > { %v335_v10 = vpop.permute.xlu0 %334  ;;  %1227 = vmatprep.subr.mxu1 %v367_v38 }
 0x14b   : > { %v339_v13 = vsel %vm338_vm3, %v335_v10, %v337_v41  ;;  %v340_v44 = vsel %vm338_vm3, %v337_v41, %v335_v10  ;;  %1228 = vmatpush1.msra.mxu1 %v366_v62 }
 0x14c   : > { %919 = vmatmul.mubr.f32.gmra.mxu0 %v745_v63  ;;  %v349_v47 = vmul.f32 %v2744_v56, %v340_v44  ;;  %v350_v11 = vmul.f32 %v2747_v57, %v339_v13 }
 0x14d   : > { %924 = vmatprep.mubr.f32.mxu0 %v749_v0  ;;  %v318_v16 = vpop.permute.xlu1 %317 }
 0x14e   : > { %v316_v25 = vpop.permute.xlu0 %315  ;;  %1229 = vmatprep.subr.mxu1 %v350_v11 }
 0x14f   : > { %v322_v26 = vsel %vm321_vm5, %v316_v25, %v318_v16  ;;  %v323_v56 = vsel %vm321_vm5, %v318_v16, %v316_v25  ;;  %1230 = vmatpush1.msra.mxu1 %v349_v47 }
 0x150   : > { %925 = vmatmul.mubr.f32.gmra.mxu0 %v748_v15  ;;  %v332_v57 = vmul.f32 %v2796_v48, %v323_v56  ;;  %v333_v27 = vmul.f32 %v2799_v49, %v322_v26  ;;  %v754_v48 = vld [vmem:[%s3649_s2 + $0xa8] sm:$0xff] }
 0x151   : > { %930 = vmatprep.mubr.f32.mxu0 %v752_v22  ;;  %v718_v49 = vld [vmem:[%s3648_s1 + $0x8] sm:$0xff] }
 0x152   : > { %1231 = vmatprep.subr.mxu1 %v333_v27 }
 0x153   : > { %1232 = vmatpush1.msra.mxu1 %v332_v57 }
 0x154   : > { %931 = vmatmul.mubr.f32.gmra.mxu0 %v751_v28  ;;  %1849 = vmatmul.mubr.msk.f32.vlgmr.msra.gmra.mxu1 %vm1152_vm9, %v717_v17 }
 0x155   : > { %936 = vmatprep.mubr.f32.mxu0 %v755_v12  ;;  %1271 = vmatprep.mubr.f32.mxu1 %v2232_v9 }
 0x158   : > { %937 = vmatmul.mubr.f32.gmra.mxu0 %v754_v48  ;;  %1850 = vmatmul.mubr.msk.f32.gmra.mxu1 %vm1152_vm9, %v718_v49 }
 0x159   : > { %942 = vmatprep.mubr.f32.mxu0 %v758_v14  ;;  %1277 = vmatprep.mubr.f32.mxu1 %v2232_v9 }
 0x15c   : > { %943 = vmatmul.mubr.f32.gmra.mxu0 %v757_v29  ;;  %1851 = vmatmul.mubr.msk.f32.gmra.mxu1 %vm1152_vm9, %v719_v30 }
 0x15d   : > { %948 = vmatprep.mubr.f32.mxu0 %v761_v31  ;;  %1283 = vmatprep.mubr.f32.mxu1 %v2232_v9 }
 0x160   : > { %949 = vmatmul.mubr.f32.gmra.mxu0 %v760_v32  ;;  %1852 = vmatmul.mubr.msk.f32.gmra.mxu1 %vm1152_vm9, %v720_v33 }
 0x161   : > { %954 = vmatprep.mubr.f32.mxu0 %v764_v34  ;;  %1289 = vmatprep.mubr.f32.mxu1 %v2232_v9 }
 0x164   : > { %955 = vmatmul.mubr.f32.gmra.mxu0 %v763_v37  ;;  %1853 = vmatmul.mubr.msk.f32.gmra.mxu1 %vm1152_vm9, %v721_v4 }
 0x165   : > { %960 = vmatprep.mubr.f32.mxu0 %v767_v2  ;;  %1295 = vmatprep.mubr.f32.mxu1 %v2232_v9 }
 0x168   : > { %961 = vmatmul.mubr.f32.gmra.mxu0 %v766_v3  ;;  %1854 = vmatmul.mubr.msk.f32.gmra.mxu1 %vm1152_vm9, %v722_v1 }
 0x169   : > { %966 = vmatprep.mubr.f32.mxu0 %v770_v54  ;;  %1301 = vmatprep.mubr.f32.mxu1 %v2232_v9 }
 0x16c   : > { %967 = vmatmul.mubr.f32.gmra.mxu0 %v769_v5  ;;  %1855 = vmatmul.mubr.msk.f32.gmra.mxu1 %vm1152_vm9, %v723_v55 }
 0x16d   : > { %972 = vmatprep.mubr.f32.mxu0 %v773_v6  ;;  %1307 = vmatprep.mubr.f32.mxu1 %v2232_v9 }
 0x170   : > { %973 = vmatmul.mubr.f32.gmra.mxu0 %v772_v45  ;;  %1856 = vmatmul.mubr.msk.f32.gmra.mxu1 %vm1152_vm9, %v724_v7 }
 0x171   : > { %978 = vmatprep.mubr.f32.mxu0 %v776_v8  ;;  %1313 = vmatprep.mubr.f32.mxu1 %v2232_v9 }
 0x174   : > { %979 = vmatmul.mubr.f32.gmra.mxu0 %v775_v46  ;;  %1857 = vmatmul.mubr.msk.f32.gmra.mxu1 %vm1152_vm9, %v725_v39 }
 0x175   : > { %984 = vmatprep.mubr.f32.mxu0 %v779_v60  ;;  %1319 = vmatprep.mubr.f32.mxu1 %v2232_v9 }
 0x178   : > { %985 = vmatmul.mubr.f32.gmra.mxu0 %v778_v61  ;;  %1858 = vmatmul.mubr.msk.f32.gmra.mxu1 %vm1152_vm9, %v726_v51 }
 0x179   : > { %1055 = vmatprep.mubr.f32.mxu0 %v2232_v9  ;;  %1325 = vmatprep.mubr.f32.mxu1 %v2232_v9 }
 0x17c   : > { %1833 = vmatmul.mubr.msk.f32.vlgmr.msra.gmra.mxu0 %vm781_vm4, %v735_v24  ;;  %1859 = vmatmul.mubr.msk.f32.gmra.mxu1 %vm1152_vm9, %v727_v50 }
 0x17d   : > { %1331 = vmatprep.mubr.f32.mxu1 %v2232_v9 }
 0x180   : > { %1860 = vmatmul.mubr.msk.f32.gmra.mxu1 %vm1152_vm9, %v728_v23 }
 0x181   : > { %1337 = vmatprep.mubr.f32.mxu1 %v2232_v9 }
 0x183   : > { %v1386_v61 = vpop.permute.xlu1 %1385 }
 0x184   : > { %1861 = vmatmul.mubr.msk.f32.gmra.mxu1 %vm1152_vm9, %v729_v40 }
 0x185   : > { %1343 = vmatprep.mubr.f32.mxu1 %v2232_v9 }
 0x188   : > { %1862 = vmatmul.mubr.msk.f32.gmra.mxu1 %vm1152_vm9, %v730_v42 }
 0x189   : > { %1349 = vmatprep.mubr.f32.mxu1 %v2232_v9 }
 0x18c   : > { %1863 = vmatmul.mubr.msk.f32.gmra.mxu1 %vm1152_vm9, %v731_v36 }
 0x18d   : > { %1355 = vmatprep.mubr.f32.mxu1 %v2232_v9 }
 0x190   : > { %1864 = vmatmul.mubr.msk.f32.gmra.mxu1 %vm1152_vm9, %v732_v35 }
 0x1a4   : > { %v1063_v20 = vpop.f32.mrf.mxu1 }
 0x1a6   : > { %v1065_v21 = vpop.f32.mrf.mxu1 }
 0x1a8   : > { %v1069_v53 = vpop.f32.mrf.mxu1 }
 0x1aa   : > { %v1071_v43 = vpop.f32.mrf.mxu1 }
 0x1ac   : > { %v3269_v52 = vpop.f32.mrf.mxu1 }
 0x1ae   : > { %v3271_v58 = vpop.f32.mrf.mxu1 }
 0x1b0   : > { %v3273_v59 = vpop.f32.mrf.mxu1 }
 0x1b2   : > { %v3275_v19 = vpop.f32.mrf.mxu1 }
 0x1b4   : > { %v3277_v18 = vpop.f32.mrf.mxu1 }
 0x1b6   : > { %v3279_v9 = vpop.f32.mrf.mxu1 }
 0x1b8   : > { %v3281_v62 = vpop.f32.mrf.mxu1 }
 0x1ba   : > { %v3283_v38 = vpop.f32.mrf.mxu1 }
 0x1bc   : > { %v3285_v63 = vpop.f32.mrf.mxu1 }
 0x1be   : > { %v3287_v41 = vpop.f32.mrf.mxu1 }
 0x1c0   : > { %v3289_v0 = vpop.f32.mrf.mxu1 }
 0x1c2   : > { %v3291_v10 = vpop.f32.mrf.mxu1 }
 0x1c4   : > { %v3293_v13 = vpop.f32.mrf.mxu1 }
 0x1c6   : > { %v3295_v44 = vpop.f32.mrf.mxu1 }
 0x1c8   : > { %v3297_v47 = vpop.f32.mrf.mxu1 }
 0x1ca   : > { %v3299_v11 = vpop.f32.mrf.mxu1 }
 0x1cc   : > { %v3301_v15 = vpop.f32.mrf.mxu1 }
 0x1ce   : > { %v3303_v16 = vpop.f32.mrf.mxu1 }
 0x1d0   : > { %v3305_v22 = vpop.f32.mrf.mxu1 }
 0x1d1   : > { %3681 = vst [vmem:[#allocation19_spill] sm:$0xff] %v3305_v22 }
 0x1d2   : > { %v3307_v25 = vpop.f32.mrf.mxu1 }
 0x1d3   : > { %3682 = vst [vmem:[#allocation20_spill] sm:$0xff] %v3307_v25 }
 0x1d4   : > { %v3313_v57 = vpop.f32.mrf.mxu1 }
 0x1d5   : > { %3684 = vst [vmem:[#allocation22_spill] sm:$0xff] %v3313_v57  ;;  %v1391_v57 = vpop.permute.xlu1 %1390 }
 0x1d6   : > { %v3315_v17 = vpop.f32.mrf.mxu1 }
 0x1d7   : > { %3685 = vst [vmem:[#allocation23_spill] sm:$0xff] %v3315_v17 }
 0x1d8   : > { %v3317_v49 = vpop.f32.mrf.mxu1 }
 0x1d9   : > { %3686 = vst [vmem:[#allocation24_spill] sm:$0xff] %v3317_v49 }
 0x1da   : > { %v3321_v30 = vpop.f32.mrf.mxu1 }
 0x1db   : > { %3687 = vst [vmem:[#allocation25_spill] sm:$0xff] %v3321_v30 }
 0x1dc   : > { %v3323_v33 = vpop.f32.mrf.mxu1 }
 0x1dd   : > { %3688 = vst [vmem:[#allocation26_spill] sm:$0xff] %v3323_v33 }
 0x1de   : > { %v3329_v4 = vpop.f32.mrf.mxu1 }
 0x1df   : > { %3689 = vst [vmem:[#allocation27_spill] sm:$0xff] %v3329_v4 }
 0x1fc   : > { %v3309_v26 = vpop.f32.mrf.mxu0 }
 0x1fe   : > { %v3311_v56 = vpop.f32.mrf.mxu0 }
 0x1ff   : > { %3683 = vst [vmem:[#allocation21_spill] sm:$0xff] %v3311_v56  ;;  %v3355_v56 = vpop.permute.xlu0 %1380 }
 0x200   : > { %v902_v27 = vpop.f32.mrf.mxu0  ;;  %3691 = vst [vmem:[#allocation29_spill] sm:$0xff] %v3355_v56 }
 0x201   : > { %v1064_v24 = vadd.f32 %v1063_v20, %v902_v27 }
 0x202   : > { %v904_v28 = vpop.f32.mrf.mxu0 }
 0x203   : > { %v1066_v23 = vadd.f32 %v1065_v21, %v904_v28 }
 0x204   : > { %v908_v12 = vpop.f32.mrf.mxu0 }
 0x205   : > { %v1070_v42 = vadd.f32 %v1069_v53, %v908_v12 }
 0x206   : > { %v910_v48 = vpop.f32.mrf.mxu0 }
 0x207   : > { %v1072_v4 = vadd.f32 %v1071_v43, %v910_v48 }
 0x208   : > { %v914_v14 = vpop.f32.mrf.mxu0 }
 0x209   : > { %v1076_v43 = vadd.f32 %v3269_v52, %v914_v14 }
 0x20a   : > { %v3319_v29 = vpop.f32.mrf.mxu0 }
 0x20b   : > { %v1078_v14 = vadd.f32 %v3271_v58, %v3319_v29 }
 0x20c   : > { %v920_v31 = vpop.f32.mrf.mxu0 }
 0x20e   : > { %v922_v32 = vpop.f32.mrf.mxu0 }
 0x210   : > { %v3325_v34 = vpop.f32.mrf.mxu0 }
 0x212   : > { %v3327_v37 = vpop.f32.mrf.mxu0 }
 0x214   : > { %v3331_v2 = vpop.f32.mrf.mxu0  ;;  %v3333_v3 = vpop.f32.mrf.mxu1 }
 0x216   : > { %v3335_v1 = vpop.f32.mrf.mxu0  ;;  %v3337_v54 = vpop.f32.mrf.mxu1 }
 0x217   : > { %3690 = vst [vmem:[#allocation28_spill] sm:$0xff] %v3337_v54 }
 0x218   : > { %v3339_v5 = vpop.f32.mrf.mxu0  ;;  %v1273_v55 = vpop.f32.mrf.mxu1 }
 0x219   : > { %v1274_v36 = vadd.f32 %v1273_v55, %v1064_v24  ;;  %v1082_v55 = vadd.f32 %v3273_v59, %v920_v31  ;;  %v1401_v24 = vpop.permute.xlu1 %1400 }
 0x21a   : > { %v3341_v6 = vpop.f32.mrf.mxu0  ;;  %v1275_v45 = vpop.f32.mrf.mxu1 }
 0x21b   : > { %v1276_v33 = vadd.f32 %v1275_v45, %v1066_v23  ;;  %v1460_v22 = vadd.f32 %v1386_v61, %v1274_v36  ;;  %v1396_v36 = vpop.permute.xlu0 %1395 }
 0x21c   : > { %v3343_v7 = vpop.f32.mrf.mxu0  ;;  %v1279_v8 = vpop.f32.mrf.mxu1 }
 0x21d   : > { %v1280_v49 = vadd.f32 %v1279_v8, %v1070_v42  ;;  %v1461_v21 = vadd.f32 %v1386_v61, %v1276_v33  ;;  %v1492_v45 = vmul.f32 0.5, %v1460_v22 }
 0x21e   : > { %v3345_v46 = vpop.f32.mrf.mxu0  ;;  %v1281_v39 = vpop.f32.mrf.mxu1 }
 0x21f   : > { %v1282_v54 = vadd.f32 %v1281_v39, %v1072_v4  ;;  %v1462_v53 = vadd.f32 %v1391_v57, %v1280_v49  ;;  %v1493_v4 = vmul.f32 0.5, %v1461_v21  ;;  %1997 = vtanh.f32 %v1492_v45  ;;  %v1411_v21 = vpop.permute.xlu1 %1410 }
 0x220   : > { %v3347_v60 = vpop.f32.mrf.mxu0  ;;  %v1285_v51 = vpop.f32.mrf.mxu1 }
 0x221   : > { %v1463_v12 = vadd.f32 %v1391_v57, %v1282_v54  ;;  %v1286_v39 = vadd.f32 %v1285_v51, %v1076_v43  ;;  %v1494_v42 = vmul.f32 0.5, %v1462_v53  ;;  %v1084_v57 = vadd.f32 %v3275_v19, %v922_v32  ;;  %v1406_v43 = vpop.permute.xlu0 %1405 }
 0x222   : > { %v3349_v50 = vpop.f32.mrf.mxu0  ;;  %v1287_v40 = vpop.f32.mrf.mxu1  ;;  %1999 = vtanh.f32 %v1493_v4  ;;  %v1090_v19 = vadd.f32 %v3279_v9, %v3327_v37  ;;  %v1094_v9 = vadd.f32 %v3281_v62, %v3331_v2  ;;  %v1102_v62 = vadd.f32 %v3287_v41, %v3341_v6 }
 0x223   : > { %v1495_v49 = vmul.f32 0.5, %v1463_v12  ;;  %v1464_v59 = vadd.f32 %v1396_v36, %v1286_v39  ;;  %2001 = vtanh.f32 %v1494_v42  ;;  %v1288_v32 = vadd.f32 %v1287_v40, %v1078_v14  ;;  %v3390_v40 = vpop.permute.xlu1 %1440 }
 0x224   : > { %v3351_v35 = vpop.f32.mrf.mxu0  ;;  %v1291_v30 = vpop.f32.mrf.mxu1  ;;  %v1106_v2 = vadd.f32 %v3289_v0, %v3343_v7  ;;  %v3416_v41 = vadd.f32 %v3295_v44, %v3349_v50 }
 0x225   : > { %v1292_v33 = vadd.f32 %v1291_v30, %v1082_v55  ;;  %v1088_v30 = vadd.f32 %v3277_v18, %v3325_v34  ;;  %2003 = vtanh.f32 %v1495_v49  ;;  %v1496_v55 = vmul.f32 0.5, %v1464_v59 }
 0x226   : > { %v3353_v17 = vpop.f32.mrf.mxu0  ;;  %v1293_v25 = vpop.f32.mrf.mxu1 }
 0x227   : > { %v1466_v31 = vadd.f32 %v1401_v24, %v1292_v33  ;;  %v1294_v51 = vadd.f32 %v1293_v25, %v1084_v57  ;;  %v1465_v25 = vadd.f32 %v1396_v36, %v1288_v32  ;;  %2005 = vtanh.f32 %v1496_v55  ;;  %v1416_v36 = vpop.permute.xlu0 %1415 }
 0x228   : > { %v3357_v20 = vpop.f32.mrf.mxu0  ;;  %v1297_v27 = vpop.f32.mrf.mxu1 }
 0x229   : > { %v1298_v58 = vadd.f32 %v1297_v27, %v1088_v30  ;;  %v1498_v45 = vmul.f32 0.5, %v1466_v31  ;;  %v1467_v18 = vadd.f32 %v1401_v24, %v1294_v51  ;;  %v1100_v24 = vadd.f32 %v3285_v63, %v3339_v5 }
 0x22a   : > { %v3359_v28 = vpop.f32.mrf.mxu0  ;;  %v1299_v48 = vpop.f32.mrf.mxu1  ;;  %v3412_v63 = vadd.f32 %v3293_v13, %v3347_v60  ;;  %v3427_v13 = vadd.f32 %v3299_v11, %v3353_v17 }
 0x22b   : > { %v1300_v4 = vadd.f32 %v1299_v48, %v1090_v19  ;;  %v1468_v37 = vadd.f32 %v1406_v43, %v1298_v58  ;;  %v1096_v48 = vadd.f32 %v3283_v38, %v3335_v1  ;;  %2007 = vtanh.f32 %v1498_v45  ;;  %v3442_v17 = vpop.permute.xlu0 %1445  ;;  %v3693_v58 = vld [vmem:[#allocation21_spill] sm:$0xff] }
 0x22c   : > { %v3363_v8 = vpop.f32.mrf.mxu0  ;;  %v1303_v23 = vpop.f32.mrf.mxu1  ;;  %v1499_v57 = vmul.f32 0.5, %v1467_v18  ;;  %v3408_v38 = vadd.f32 %v3291_v10, %v3345_v46  ;;  %v1497_v1 = vmul.f32 0.5, %v1465_v25  ;;  %v3423_v46 = vadd.f32 %v3297_v47, %v3351_v35  ;;  %v3694_v18 = vld [vmem:[#allocation19_spill] sm:$0xff] }
 0x22d   : > { %v1469_v33 = vadd.f32 %v1406_v43, %v1300_v4  ;;  %v1304_v59 = vadd.f32 %v1303_v23, %v1094_v9  ;;  %v1998_v30 = vpop.eup %1997  ;;  %v1500_v0 = vmul.f32 0.5, %v1468_v37  ;;  %v3440_v11 = vadd.f32 %v3303_v16, %v3359_v28  ;;  %v3692_v43 = vld [vmem:[#allocation29_spill] sm:$0xff] }
 0x22e   : > { %v3365_v61 = vpop.f32.mrf.mxu0  ;;  %v1305_v56 = vpop.f32.mrf.mxu1  ;;  %2009 = vtanh.f32 %v1499_v57  ;;  %v1540_v32 = vadd.f32 1.0, %v1998_v30  ;;  %v1130_v25 = vadd.f32 %v3694_v18, %v3363_v8  ;;  %v3696_v57 = vld [vmem:[#allocation28_spill] sm:$0xff] }
 0x22f   : > { %v1306_v5 = vadd.f32 %v1305_v56, %v1096_v48  ;;  %v2000_v10 = vpop.eup %1999  ;;  %v3431_v56 = vadd.f32 %v3301_v15, %v3357_v20  ;;  %v1501_v44 = vmul.f32 0.5, %v1469_v33  ;;  %2011 = vtanh.f32 %v1497_v1  ;;  %v3695_v48 = vld [vmem:[#allocation20_spill] sm:$0xff] }
 0x230   : > { %v3367_v52 = vpop.f32.mrf.mxu0  ;;  %v1309_v22 = vpop.f32.mrf.mxu1  ;;  %2013 = vtanh.f32 %v1500_v0  ;;  %v3456_v1 = vmul.f32 0.5, %v1540_v32 }
 0x231   : > { %v1310_v6 = vadd.f32 %v1309_v22, %v1100_v24  ;;  %v2002_v50 = vpop.eup %2001  ;;  %v3433_v22 = vpop.permute.xlu1 %1450  ;;  %v1471_v15 = vadd.f32 %v1411_v21, %v1306_v5  ;;  %2015 = vtanh.f32 %v1501_v44  ;;  %v1132_v24 = vadd.f32 %v3695_v48, %v3365_v61  ;;  %v3697_v5 = vld [vmem:[#allocation22_spill] sm:$0xff]  ;;  %v3698_v61 = vld [vmem:[#allocation23_spill] sm:$0xff] }
 0x232   : > { %v3372_v54 = vpop.f32.mrf.mxu0  ;;  %v1311_v53 = vpop.f32.mrf.mxu1  ;;  %v1542_v4 = vadd.f32 1.0, %v2002_v50  ;;  %v3699_v50 = vld [vmem:[#allocation24_spill] sm:$0xff] }
 0x233   : > { %v1312_v51 = vadd.f32 %v1311_v53, %v1102_v62  ;;  %v2004_v35 = vpop.eup %2003  ;;  %v1472_v20 = vadd.f32 %v1416_v36, %v1310_v6  ;;  %v1503_v33 = vmul.f32 0.5, %v1471_v15  ;;  %v3700_v15 = vld [vmem:[#allocation25_spill] sm:$0xff] }
 0x234   : > { %v3378_v12 = vpop.f32.mrf.mxu0  ;;  %v3380_v29 = vpop.f32.mrf.mxu1  ;;  %v1543_v9 = vadd.f32 1.0, %v2004_v35 }
 0x235   : > { %v1473_v28 = vadd.f32 %v1416_v36, %v1312_v51  ;;  %v1316_v62 = vadd.f32 %v3380_v29, %v1106_v2  ;;  %v1504_v8 = vmul.f32 0.5, %v1472_v20  ;;  %v1421_v30 = vpop.permute.xlu1 %1420  ;;  %v2006_v0 = vpop.eup %2005 }
 0x236   : > { %v3382_v39 = vpop.f32.mrf.mxu0  ;;  %v3384_v34 = vpop.f32.mrf.mxu1 }
 0x237   : > { %v3466_v29 = vpop.permute.xlu0 %1455  ;;  %v1318_v35 = vadd.f32 %v3384_v34, %v3408_v38  ;;  %v1144_v20 = vadd.f32 %v3700_v15, %v3382_v39 }
 0x238   : > { %v3386_v42 = vpop.f32.mrf.mxu0  ;;  %v3392_v27 = vpop.f32.mrf.mxu1 }
 0x239   : > { %v2008_v44 = vpop.eup %2007 }
 0x23a   : > { %v3398_v49 = vpop.f32.mrf.mxu0  ;;  %v3404_v14 = vpop.f32.mrf.mxu1 }
 0x23b   : > { %v1426_v39 = vpop.permute.xlu0 %1425 }
 0x23c   : > { %v1057_v31 = vpop.f32.mrf.mxu0  ;;  %v3419_v23 = vpop.f32.mrf.mxu1 }
 0x23d   : > { %v1058_v7 = vadd.f32 %v1057_v31, %v3309_v26  ;;  %v1470_v26 = vadd.f32 %v1411_v21, %v1304_v59  ;;  %v1136_v31 = vadd.f32 %v3697_v5, %v3367_v52  ;;  %v1505_v52 = vmul.f32 0.5, %v1473_v28 }
 0x23e   : > { %v1059_v60 = vpop.f32.mrf.mxu0  ;;  %v3436_v47 = vpop.f32.mrf.mxu1  ;;  %v1475_v28 = vadd.f32 %v1421_v30, %v1318_v35 }
 0x23f   : > { %v1268_v19 = vadd.f32 %v3333_v3, %v1058_v7  ;;  %v1060_v53 = vadd.f32 %v1059_v60, %v3693_v58  ;;  %v1541_v3 = vadd.f32 1.0, %v2000_v10  ;;  %v1502_v16 = vmul.f32 0.5, %v1470_v26 }
 0x240   : > { %v3446_v45 = vpop.f32.mrf.mxu1  ;;  %v3462_v7 = vmul.f32 0.5, %v1542_v4  ;;  %v1138_v10 = vadd.f32 %v3698_v61, %v3372_v54  ;;  %v3469_v60 = vmul.f32 0.5, %v1543_v9  ;;  %v1142_v26 = vadd.f32 %v3699_v50, %v3378_v12  ;;  %v2010_v9 = vpop.eup %2009 }
 0x241   : > { %v1458_v55 = vadd.f32 %v3692_v43, %v1268_v19  ;;  %v1270_v59 = vadd.f32 %v3696_v57, %v1060_v53  ;;  %v3460_v6 = vmul.f32 0.5, %v1541_v3  ;;  %v1474_v19 = vadd.f32 %v1421_v30, %v1316_v62  ;;  %v3701_v53 = vld [vmem:[#allocation26_spill] sm:$0xff]  ;;  %v3485_v48 = vpop.eup %2011 }
 0x242   : > { %v3450_v37 = vpop.f32.mrf.mxu1  ;;  %v3475_v54 = vadd.f32 1.0, %v2006_v0  ;;  %v1546_v58 = vadd.f32 1.0, %v2008_v44  ;;  %v1148_v3 = vadd.f32 %v3701_v53, %v3386_v42  ;;  %v1322_v4 = vadd.f32 %v3392_v27, %v3412_v63  ;;  %v3702_v42 = vld [vmem:[#allocation27_spill] sm:$0xff]  ;;  %v2014_v62 = vpop.eup %2013 }
 0x243   : > { %v1490_v21 = vmul.f32 0.5, %v1458_v55  ;;  %v1459_v2 = vadd.f32 %v3692_v43, %v1270_v59  ;;  %v1328_v30 = vadd.f32 %v3419_v23, %v3423_v46  ;;  %v1507_v61 = vmul.f32 0.5, %v1475_v28 }
 0x244   : > { %v1339_v36 = vpop.f32.mrf.mxu1  ;;  %v1570_v57 = vmul.f32 0.5, %v1546_v58  ;;  %v1336_v23 = vadd.f32 %v3450_v37, %v3440_v11 }
 0x245   : > { %2017 = vtanh.f32 %v1490_v21  ;;  %v1491_v32 = vmul.f32 0.5, %v1459_v2  ;;  %v1340_v43 = vadd.f32 %v1339_v36, %v1130_v25  ;;  %v1431_v36 = vpop.permute.xlu1 %1430 }
 0x246   : > { %2019 = vtanh.f32 %v1502_v16  ;;  %v1341_v51 = vpop.f32.mrf.mxu1  ;;  %v1506_v16 = vmul.f32 0.5, %v1474_v19 }
 0x247   : > { %2021 = vtanh.f32 %v1503_v33  ;;  %v1342_v12 = vadd.f32 %v1341_v51, %v1132_v24  ;;  %v1482_v34 = vadd.f32 %v3390_v40, %v1340_v43  ;;  %v1150_v24 = vadd.f32 %v3702_v42, %v3398_v49  ;;  %v1594_v43 = vld [vmem:[%s2409_s21] sm:$0xff]  ;;  %v1597_v42 = vld [vmem:[%s2409_s21 + $0x18] sm:$0xff] }
 0x248   : > { %2023 = vtanh.f32 %v1504_v8  ;;  %v1345_v55 = vpop.f32.mrf.mxu1  ;;  %v1324_v33 = vadd.f32 %v3404_v14, %v3416_v41  ;;  %v1476_v8 = vadd.f32 %v1426_v39, %v1322_v4  ;;  %v1330_v14 = vadd.f32 %v3436_v47, %v3427_v13 }
 0x249   : > { %2025 = vtanh.f32 %v1491_v32  ;;  %v1346_v38 = vadd.f32 %v1345_v55, %v1136_v31  ;;  %v1483_v25 = vadd.f32 %v3390_v40, %v1342_v12  ;;  %v2016_v40 = vpop.eup %2015  ;;  %v1547_v31 = vadd.f32 1.0, %v2010_v9  ;;  %v1436_v32 = vpop.permute.xlu0 %1435  ;;  %v1595_v12 = vld [vmem:[%s2409_s21 + $0x8] sm:$0xff] }
 0x24a   : > { %2027 = vtanh.f32 %v1505_v52  ;;  %v1347_v18 = vpop.f32.mrf.mxu1  ;;  %v1548_v13 = vadd.f32 1.0, %v2014_v62  ;;  %v1549_v47 = vadd.f32 1.0, %v2016_v40  ;;  %v1479_v35 = vadd.f32 %v1431_v36, %v1330_v14 }
 0x24b   : > { %v1348_v21 = vadd.f32 %v1347_v18, %v1138_v10  ;;  %2029 = vtanh.f32 %v1482_v34  ;;  %v1484_v27 = vadd.f32 %v3442_v17, %v1346_v38  ;;  %v1334_v10 = vadd.f32 %v3446_v45, %v3431_v56 }
 0x24c   : > { %v1351_v63 = vpop.f32.mrf.mxu1  ;;  %2031 = vtanh.f32 %v1483_v25  ;;  %v1571_v11 = vmul.f32 0.5, %v1547_v31  ;;  %v1481_v58 = vadd.f32 %v1436_v32, %v1336_v23  ;;  %v1572_v4 = vmul.f32 0.5, %v1548_v13 }
 0x24d   : > { %v1485_v59 = vadd.f32 %v3442_v17, %v1348_v21  ;;  %v1352_v5 = vadd.f32 %v1351_v63, %v1142_v26  ;;  %2033 = vtanh.f32 %v1484_v27  ;;  %v1477_v17 = vadd.f32 %v1426_v39, %v1324_v33 }
 0x24e   : > { %v1353_v49 = vpop.f32.mrf.mxu1  ;;  %v1478_v26 = vadd.f32 %v1431_v36, %v1328_v30  ;;  %v1480_v37 = vadd.f32 %v1436_v32, %v1334_v10  ;;  %v1573_v28 = vmul.f32 0.5, %v1549_v47  ;;  %v1511_v25 = vmul.f32 0.5, %v1479_v35  ;;  %v1599_v10 = vld [vmem:[%s2409_s21 + $0x28] sm:$0xff]  ;;  %v1600_v35 = vld [vmem:[%s2409_s21 + $0x30] sm:$0xff] }
 0x24f   : > { %2035 = vtanh.f32 %v1485_v59  ;;  %v1486_v41 = vadd.f32 %v3433_v22, %v1352_v5  ;;  %v1354_v0 = vadd.f32 %v1353_v49, %v1144_v20  ;;  %v1509_v55 = vmul.f32 0.5, %v1477_v17  ;;  %v1598_v49 = vld [vmem:[%s2409_s21 + $0x20] sm:$0xff] }
 0x250   : > { %2037 = vtanh.f32 %v1506_v16  ;;  %v1357_v2 = vpop.f32.mrf.mxu1  ;;  %v1510_v18 = vmul.f32 0.5, %v1478_v26  ;;  %v1596_v16 = vld [vmem:[%s2409_s21 + $0x10] sm:$0xff]  ;;  %v1602_v21 = vmul.f32 %v1594_v43, %v1570_v57  ;;  %v1512_v33 = vmul.f32 0.5, %v1480_v37 }
 0x251   : > { %2039 = vtanh.f32 %v1486_v41  ;;  %v1487_v46 = vadd.f32 %v3433_v22, %v1354_v0  ;;  %v1358_v52 = vadd.f32 %v1357_v2, %v1148_v3  ;;  %v1508_v22 = vmul.f32 0.5, %v1476_v8 }
 0x252   : > { %v2018_v44 = vpop.eup %2017  ;;  %v1359_v51 = vpop.f32.mrf.mxu1  ;;  %v1513_v62 = vmul.f32 0.5, %v1481_v58  ;;  %v1604_v5 = vmul.f32 %v1596_v16, %v1572_v4  ;;  %v1605_v30 = vmul.f32 %v1597_v42, %v1573_v28 }
 0x253   : > { %v1538_v50 = vadd.f32 1.0, %v2018_v44  ;;  %v2020_v19 = vpop.eup %2019  ;;  %2041 = vtanh.f32 %v1487_v46  ;;  %v1488_v56 = vadd.f32 %v3466_v29, %v1358_v52  ;;  %v1360_v45 = vadd.f32 %v1359_v51, %v1150_v24 }
 0x254   : > { %v2022_v15 = vpop.eup %2021  ;;  %2043 = vtanh.f32 %v1507_v61  ;;  %v1550_v34 = vadd.f32 1.0, %v2020_v19  ;;  %v1545_v52 = vadd.f32 1.0, %v3485_v48  ;;  %v1568_v19 = vmul.f32 0.5, %v3475_v54 }
 0x255   : > { %v2024_v20 = vpop.eup %2023  ;;  %2045 = vtanh.f32 %v1488_v56  ;;  %v1489_v53 = vadd.f32 %v3466_v29, %v1360_v45  ;;  %v1562_v38 = vmul.f32 0.5, %v1538_v50  ;;  %v1551_v24 = vadd.f32 1.0, %v2022_v15 }
 0x256   : > { %v2026_v3 = vpop.eup %2025  ;;  %v1603_v29 = vmul.f32 %v1595_v12, %v1571_v11  ;;  %v1574_v40 = vmul.f32 0.5, %v1550_v34  ;;  %v1552_v57 = vadd.f32 1.0, %v2024_v20  ;;  %v1601_v11 = vld [vmem:[%s2409_s21 + $0x38] sm:$0xff] }
 0x257   : > { %v2028_v9 = vpop.eup %2027  ;;  %v1539_v39 = vadd.f32 1.0, %v2026_v3  ;;  %2047 = vtanh.f32 %v1489_v53  ;;  %v1575_v41 = vmul.f32 0.5, %v1551_v24 }
 0x258   : > { %2049 = vtanh.f32 %v1508_v22  ;;  %v2030_v27 = vpop.eup %2029  ;;  %v1553_v2 = vadd.f32 1.0, %v2028_v9  ;;  %v1606_v13 = vmul.f32 %v1598_v49, %v1574_v40  ;;  %v1576_v50 = vmul.f32 0.5, %v1552_v57 }
 0x259   : > { %2051 = vtanh.f32 %v1509_v55  ;;  %v1563_v63 = vmul.f32 0.5, %v1539_v39  ;;  %v2032_v59 = vpop.eup %2031  ;;  %v1610_v31 = vmul.f32 %v2030_v27, %v1562_v38 }
 0x25a   : > { %2053 = vtanh.f32 %v1510_v18  ;;  %v2034_v8 = vpop.eup %2033  ;;  %v1577_v32 = vmul.f32 0.5, %v1553_v2  ;;  %v1608_v22 = vmul.f32 %v1600_v35, %v1576_v50 }
 0x25b   : > { %2055 = vtanh.f32 %v1511_v25  ;;  %v1611_v36 = vmul.f32 %v2032_v59, %v1563_v63  ;;  %v1618_v0 = vadd.f32 %v1610_v31, %v1602_v21  ;;  %v1612_v61 = vmul.f32 %v2034_v8, %v3456_v1 }
 0x25c   : > { %v2036_v14 = vpop.eup %2035  ;;  %2057 = vtanh.f32 %v1512_v33  ;;  %v1609_v55 = vmul.f32 %v1601_v11, %v1577_v32 }
 0x25d   : > { %v2038_v17 = vpop.eup %2037  ;;  %2059 = vtanh.f32 %v1513_v62  ;;  %v1619_v44 = vadd.f32 %v1611_v36, %v1603_v29  ;;  %v1613_v23 = vmul.f32 %v2036_v14, %v3460_v6  ;;  %1642 = vst [vmem:[%s2409_s21] sm:$0xff] %v1618_v0  ;;  %v1620_v47 = vadd.f32 %v1612_v61, %v1604_v5 }
 0x25e   : > { %v2040_v46 = vpop.eup %2039  ;;  %2061 = vtanh.f32 %v1618_v0  ;;  %v1607_v6 = vmul.f32 %v1599_v10, %v1575_v41  ;;  %v1554_v3 = vadd.f32 1.0, %v2038_v17 }
 0x25f   : > { %2063 = vtanh.f32 %v1619_v44  ;;  %1643 = vst [vmem:[%s2409_s21 + $0x8] sm:$0xff] %v1619_v44  ;;  %v1621_v1 = vadd.f32 %v1613_v23, %v1605_v30  ;;  %v1614_v26 = vmul.f32 %v2040_v46, %v3462_v7  ;;  %1644 = vst [vmem:[%s2409_s21 + $0x10] sm:$0xff] %v1620_v47  ;;  %v1569_v7 = vmul.f32 0.5, %v1545_v52 }
 0x260   : > { %v2042_v51 = vpop.eup %2041  ;;  %2065 = vtanh.f32 %v1620_v47  ;;  %v1578_v39 = vmul.f32 0.5, %v1554_v3 }
 0x261   : > { %v2044_v48 = vpop.eup %2043  ;;  %2067 = vtanh.f32 %v1621_v1  ;;  %1645 = vst [vmem:[%s2409_s21 + $0x18] sm:$0xff] %v1621_v1  ;;  %v1622_v56 = vadd.f32 %v1614_v26, %v1606_v13  ;;  %v1615_v45 = vmul.f32 %v2042_v51, %v3469_v60 }
 0x262   : > { %v2046_v15 = vpop.eup %2045  ;;  %v1555_v4 = vadd.f32 1.0, %v2044_v48 }
 0x263   : > { %2069 = vtanh.f32 %v1622_v56  ;;  %1646 = vst [vmem:[%s2409_s21 + $0x20] sm:$0xff] %v1622_v56  ;;  %v1623_v54 = vadd.f32 %v1615_v45, %v1607_v6  ;;  %v1616_v37 = vmul.f32 %v2046_v15, %v1568_v19 }
 0x264   : > { %v2048_v20 = vpop.eup %2047 }
 0x265   : > { %v2050_v43 = vpop.eup %2049  ;;  %2071 = vtanh.f32 %v1623_v54  ;;  %1647 = vst [vmem:[%s2409_s21 + $0x28] sm:$0xff] %v1623_v54  ;;  %v1624_v58 = vadd.f32 %v1616_v37, %v1608_v22  ;;  %v1617_v53 = vmul.f32 %v2048_v20, %v1569_v7 }
 0x266   : > { %v2052_v60 = vpop.eup %2051  ;;  %v1556_v18 = vadd.f32 1.0, %v2050_v43 }
 0x267   : > { %v2054_v12 = vpop.eup %2053  ;;  %2073 = vtanh.f32 %v1624_v58  ;;  %1648 = vst [vmem:[%s2409_s21 + $0x30] sm:$0xff] %v1624_v58  ;;  %v1625_v34 = vadd.f32 %v1617_v53, %v1609_v55  ;;  %v1557_v16 = vadd.f32 1.0, %v2052_v60 }
 0x268   : > { %v2056_v38 = vpop.eup %2055 }
 0x269   : > { %v2058_v9 = vpop.eup %2057  ;;  %2075 = vtanh.f32 %v1625_v34  ;;  %1649 = vst [vmem:[%s2409_s21 + $0x38] sm:$0xff] %v1625_v34 }
 0x26a   : > { %v2060_v28 = vpop.eup %2059 }
 0x26b   : > { %2090 = shalt.err (!%p2087_p4)
}
 0x26c   : > { %s2091_s21 = scalar_lea.hbm %s3531_s13, 1024  ;;  %s2095_s16 = scalar_lea.hbm %s3653_s6, 2048 }
 0x26d   : > { %p2092_p2 = scmp.ne.s32.totalorder %s3531_s13, %s2091_s21  ;;  %p2096_p8 = scmp.lt.s32.totalorder %s3531_s13, %s3653_s6 }
 0x26e   : > { %p2097_p9 = scmp.lt.s32.totalorder %s2095_s16, %s2091_s21 }
 0x26f   : > { %p2093_p5 = pnand %p2092_p2, %p2374_p12 }
 0x270   : > { %p2098_p10 = por %p2097_p9, %p2096_p8 }
 0x271   : > { %p2094_p6 = pneg %p2093_p5 }
 0x273   : > { %p2099_p11 = pnand %p2098_p10, %p2094_p6 }
 0x275   : > { %2102 = shalt.err (!%p2099_p11)
}
 0x276   : > { %s2237_s10 = smov 256   ;;  %v2062_v25 = vpop.eup %2061  ;;  %v1579_v21 = vmul.f32 0.5, %v1555_v4  ;;  %v1558_v42 = vadd.f32 1.0, %v2054_v12  ;;  %v1580_v33 = vmul.f32 0.5, %v1556_v18  ;;  %v1581_v63 = vmul.f32 0.5, %v1557_v16  ;;  %s1867_s8 = sshll.u32 %s2207_s27, 3 }
 0x277   : > { %1884 = dma.vmem_to_hbm [thread:$0]  (%p2374_p12), %s3533_s14, 1024, %s3531_s13, %s3538_s23, %s2237_s10, %s2237_s10, %s2229_s11   ;;  %v2064_v24 = vpop.eup %2063  ;;  %v1634_v27 = vmul.f32 %v2062_v25, %v1578_v39  ;;  %v1559_v62 = vadd.f32 1.0, %v2056_v38  ;;  %v1560_v8 = vadd.f32 1.0, %v2058_v9  ;;  %v1561_v36 = vadd.f32 1.0, %v2060_v28 }
 0x278   : > { %v2066_v29 = vpop.eup %2065  ;;  %v1635_v59 = vmul.f32 %v2064_v24, %v1579_v21  ;;  %s1868_s14 = sshll.u32 %s2211_s28, 6  ;;  %v1582_v31 = vmul.f32 0.5, %v1558_v42  ;;  %s1687_s28 = sshll.u32 %s2407_s29, 4  ;;  %s3579_s28 = int_to_ptr.vmem [resolvable:$true] %s1687_s28 }
 0x279   : > { %v2068_v5 = vpop.eup %2067  ;;  %1650 = vst [vmem:[%s2407_s29] sm:$0xff] %v1634_v27  ;;  %1658 = vst [vmem:[#allocation2 + $0x30] sm:$0xff] %v1634_v27  ;;  %v1636_v40 = vmul.f32 %v2066_v29, %v1580_v33  ;;  %v1583_v57 = vmul.f32 0.5, %v1559_v62  ;;  %s1684_s13 = sadd.s32 %s1868_s14, %s1867_s8  ;;  %v1584_v0 = vmul.f32 0.5, %v1560_v8  ;;  %v1585_v10 = vmul.f32 0.5, %v1561_v36  ;;  %s3704_s26 = sand.u32 1, %s2199_s25  }
 0x27a   : > { %1651 = vst [vmem:[%s2407_s29 + $0x8] sm:$0xff] %v1635_v59  ;;  %1659 = vst [vmem:[#allocation2] sm:$0xff] %v1635_v59  ;;  %v1637_v30 = vmul.f32 %v2068_v5, %v1581_v63  ;;  %v2070_v49 = vpop.eup %2069  ;;  %s1869_s27 = sshll.u32 %s1684_s13, 7  ;;  %s1667_s21 = scalar_lea.sflag [#allocation4], %s3704_s26 }
 0x27b   : > { %1652 = vst [vmem:[%s2407_s29 + $0x10] sm:$0xff] %v1636_v40  ;;  %1660 = vst [vmem:[#allocation2 + $0x18] sm:$0xff] %v1636_v40  ;;  %v1638_v14 = vmul.f32 %v2070_v49, %v1582_v31  ;;  %v2072_v41 = vpop.eup %2071  ;;  %s3577_s20 = scalar_lea.hbm %s3652_s5, %s1869_s27  ;;  %s2103_s30 = scalar_lea.vmem %s3579_s28, 1024 }
 0x27c   : > { %1653 = vst [vmem:[%s2407_s29 + $0x18] sm:$0xff] %v1637_v30  ;;  %1661 = vst [vmem:[#allocation2 + $0x10] sm:$0xff] %v1637_v30  ;;  %v1639_v61 = vmul.f32 %v2072_v41, %v1583_v57  ;;  %v2074_v17 = vpop.eup %2073  ;;  %p2104_p12 = scmp.ne.s32.totalorder %s3579_s28, %s2103_s30  ;;  %s2238_s9 = smov [#allocation3]  }
 0x27d   : > { %1654 = vst [vmem:[%s2407_s29 + $0x20] sm:$0xff] %v1638_v14  ;;  %1662 = vst [vmem:[#allocation2 + $0x8] sm:$0xff] %v1638_v14  ;;  %v1640_v2 = vmul.f32 %v2074_v17, %v1584_v0  ;;  %v2076_v44 = vpop.eup %2075  ;;  %s2107_s16 = sshll.u32 %s2238_s9, 4  ;;  %s2108_s16 = int_to_ptr.vmem [resolvable:$false] %s2107_s16 }
 0x27e   : > { %1655 = vst [vmem:[%s2407_s29 + $0x28] sm:$0xff] %v1639_v61  ;;  %1663 = vst [vmem:[#allocation2 + $0x20] sm:$0xff] %v1639_v61  ;;  %v1641_v23 = vmul.f32 %v2076_v44, %v1585_v10  ;;  %p2105_p0 = pnand %p2104_p12, %p2347_p3  ;;  %s2109_s17 = scalar_lea.vmem %s2108_s16, 2048 }
 0x27f   : > { %1656 = vst [vmem:[%s2407_s29 + $0x30] sm:$0xff] %v1640_v2  ;;  %1664 = vst [vmem:[#allocation2 + $0x28] sm:$0xff] %v1640_v2  ;;  %p2110_p4 = scmp.lt.s32.totalorder %s3579_s28, %s2108_s16  ;;  %p2111_p2 = scmp.lt.s32.totalorder %s2109_s17, %s2103_s30 }
 0x280   : > { %1657 = vst [vmem:[%s2407_s29 + $0x38] sm:$0xff] %v1641_v23  ;;  %1665 = vst [vmem:[#allocation2 + $0x38] sm:$0xff] %v1641_v23  ;;  %p2106_p1 = pneg %p2105_p0 }
 0x281   : > { %p2112_p5 = por %p2111_p2, %p2110_p4 }
 0x283   : > { %p2113_p6 = pnand %p2112_p5, %p2106_p1 }
 0x285   : > { %2116 = shalt.err (!%p2113_p6)
}
 0x286   : > { %s2117_s29 = scalar_lea.hbm %s3577_s20, 1024  ;;  %s2121_s14 = scalar_lea.hbm %s3652_s5, 16384 }
 0x287   : > { %p2118_p8 = scmp.ne.s32.totalorder %s3577_s20, %s2117_s29  ;;  %p2122_p11 = scmp.lt.s32.totalorder %s3577_s20, %s3652_s5 }
 0x288   : > { %p2123_p12 = scmp.lt.s32.totalorder %s2121_s14, %s2117_s29 }
 0x289   : > { %p2119_p9 = pnand %p2118_p8, %p2347_p3 }
 0x28a   : > { %p2124_p0 = por %p2123_p12, %p2122_p11 }
 0x28b   : > { %p2120_p10 = pneg %p2119_p9 }
 0x28d   : > { %p2125_p1 = pnand %p2124_p0, %p2120_p10 }
 0x28f   : > { %2128 = shalt.err (!%p2125_p1)
}
 0x290   : > { %1883 = dma.vmem_to_hbm [thread:$0]  (%p2347_p3), %s3579_s28, 1024, %s3577_s20, %s1667_s21, %s2237_s10, %s2237_s10, %s2229_s11  }
 0x291 PF: > { %p1894_p4 = scmp.ge.s32.totalorder %s2223_s7, 2  ;;  %s1718_s23 = sand.u32 1, %s2195_s24  }
 0x292   : > { %s1719_s19 = scalar_lea.sflag [#allocation4], %s1718_s23 }
 0x293   : > { %p1888_p2 = pnand %p1894_p4, %p2362_p7 }
 0x295   : > { %p1889_p5 = pneg %p1888_p2 }
 0x297   : > { %2174 = dma.done.wait (%p1889_p5), %s1719_s19, 1024  }
 0x298   : > { %2176 = vsyncadd (%p1889_p5), %s1719_s19, 4294966272  ;;  %s3705_s26 = sld [smem:[#allocation9_spill]]  ;;  %p1891_p6 = pnand %p1894_p4, %p2386_p13 }
 0x29a   : > { %p1892_p8 = pneg %p1891_p6 }
 0x29e   : > { %s1727_s30 = sand.u32 1, %s3705_s26  }
 0x29f   : > { %s1728_s9 = scalar_lea.sflag [#allocation6], %s1727_s30 }
 0x2a0   : > { %2178 = dma.done.wait (%p1892_p8), %s1728_s9, 1024  }
 0x2a1   : > { %2180 = vsyncadd (%p1892_p8), %s1728_s9, 4294966272  ;;  %s23_s7 = sadd.s32 1, %s2223_s7   ;;  %s3707_s24 = sld [smem:[#allocation10_spill]] }
 0x2a2   : > { %p20_p3 = scmp.ge.s32.totalorder %s23_s7, 18   ;;  %s3708_s23 = sld [smem:[#allocation16_spill]] }
 0x2a3   : > { %s3709_s18 = sld [smem:[#allocation11_spill]]  ;;  %s3715_s21 = smov %s2187_s22 }
 0x2a4   : > { %s3710_s26 = sld [smem:[#allocation17_spill]] }
 0x2a5   : > { %s3711_s27 = sld [smem:[#allocation12_spill]]  ;;  %22 = sbr.rel (!%p20_p3) target bundleno = 9 (0x9), region = 96 }
 0x2a6   : > { %s3712_s28 = sld [smem:[#allocation13_spill]] }
 0x2a7   : > { %s3713_s29 = sld [smem:[#allocation14_spill]]  ;;  %s3716_s22 = smov %s3707_s24 }
 0x2a8   : > { %s3714_s30 = sld [smem:[#allocation15_spill]]  ;;  %s3717_s24 = smov %s2199_s25 }
 0x2a9   : > { %s3718_s25 = smov %s3709_s18 }
 0x2aa   :  { %1733 = vsyncpa [#allocation4], 1 }
 0x2ab   :  { %1735 = vsyncpa [#allocation4 + $0x1], 1 }
 0x2ac   :  { %1736 = vsyncpa [#allocation6], 1 }
 0x2ad   :  { %1738 = vsyncpa [#allocation6 + $0x1], 1 }

</bundles_post_ra>
